<compile_context>
chip_gen: v7x
topology: tpu7x:2x2x1
jax: 0.10.0
libtpu: 0.0.40
codegen_flags: <defaults>
</compile_context>

<pallas_src>
import jax
import jax.numpy as jnp
from jax import lax
from jax.experimental import pallas as pl
from jax.experimental.pallas import tpu as pltpu


def grunet_kernel(x2d_ref, wih_ref, bih_ref, whh_ref, bhh_ref,
                  fcw_ref, fcb_ref, out_ref, gi_ref, hs_ref):
    """GRU recurrence + concatenated-hidden Linear.

    x2d : (T*BP, I)   time-major input, batch zero-padded to BP rows per step
    wih : (I, GP)     fused, transposed input gate weights [Wir|Wiz|Win], lane-padded
    bih : (1, GP)     fused input bias  [b_ir|b_iz|b_in], lane-padded
    whh : (H, GP)     fused, transposed hidden gate weights [Whr|Whz|Whn], lane-padded
    bhh : (1, GP)     fused hidden bias [b_hr|b_hz|b_hn], lane-padded
    fcw : (T, H, O)   per-step fc weight slices (initial zero-hidden block dropped)
    fcb : (1, O)
    out : (B, O)
    gi  : VMEM scratch (T*BP, GP)  precomputed input projections (+ b_ih)
    hs  : VMEM scratch (T, BP, H)  hidden state of every step
    """
    T, BP, H = hs_ref.shape
    B, O = out_ref.shape

    # ---- stage 1: ALL input projections in one matmul (off the critical path)
    gi_ref[...] = (
        jnp.dot(x2d_ref[...], wih_ref[...], preferred_element_type=jnp.float32)
        + bih_ref[...])

    # Hoist loop-invariant weight / bias loads out of the recurrence.
    whh = whh_ref[...]            # (H, GP)
    bhh = bhh_ref[...]            # (1, GP)

    UNROLL = 8 if T % 8 == 0 else (4 if T % 4 == 0 else (2 if T % 2 == 0 else 1))

    # ---- stage 2: serial GRU recurrence, exactly one MXU dot per step
    def step_block(tb, h):
        for j in range(UNROLL):                       # manual unroll
            t = tb * UNROLL + j
            base = pl.multiple_of(t * BP, BP)
            gi_t = gi_ref[pl.ds(base, BP), :]                       # (BP, GP)
            gh = jnp.dot(h, whh, preferred_element_type=jnp.float32) + bhh
            r = jax.nn.sigmoid(gi_t[:, 0:H] + gh[:, 0:H])
            z = jax.nn.sigmoid(gi_t[:, H:2 * H] + gh[:, H:2 * H])
            n = jnp.tanh(gi_t[:, 2 * H:3 * H] + r * gh[:, 2 * H:3 * H])
            h = (1.0 - z) * n + z * h
            hs_ref[t] = h
        return h

    lax.fori_loop(0, T // UNROLL, step_block, jnp.zeros((BP, H), jnp.float32))

    # ---- stage 3: fc over stored hidden states (out of the recurrence loop;
    #               independent dots pipeline through the MXU)
    def fc_block(tb, acc):
        for j in range(UNROLL):                       # manual unroll
            t = tb * UNROLL + j
            acc = acc + jnp.dot(hs_ref[t], fcw_ref[t],
                                preferred_element_type=jnp.float32)
        return acc

    acc = lax.fori_loop(0, T // UNROLL, fc_block,
                        jnp.zeros((BP, O), jnp.float32))
    out_ref[...] = (acc + fcb_ref[...])[0:B, :]


def grunet_forward(x_bti, params):
    """x_bti: (B, T, input_dim); T must equal 104 (fc expects hidden*105)."""
    x_bti = jnp.asarray(x_bti, jnp.float32)
    B, T, I = x_bti.shape
    w_ih, w_hh = params["w_ih"], params["w_hh"]        # (3H, I), (3H, H)
    b_ih, b_hh = params["b_ih"], params["b_hh"]        # (3H,), (3H,)
    fc_w, fc_b = params["fc_w"], params["fc_b"]        # (O, 105H), (O,)
    H = w_hh.shape[1]
    O = fc_w.shape[0]
    assert fc_w.shape[1] == H * (T + 1), "seq length must be 104 (hidden*105 fc)"

    GP = ((3 * H + 127) // 128) * 128                  # lane-padded fused gate width
    BP = max(8, ((B + 7) // 8) * 8)                    # sublane-padded batch
    f32 = jnp.float32

    # Fused, transposed, lane-padded gate weights / biases (gate order r, z, n).
    wih_f = jnp.zeros((I, GP), f32).at[:, :3 * H].set(w_ih.T.astype(f32))
    whh_f = jnp.zeros((H, GP), f32).at[:, :3 * H].set(w_hh.T.astype(f32))
    bih = jnp.zeros((1, GP), f32).at[0, :3 * H].set(b_ih.astype(f32))
    bhh = jnp.zeros((1, GP), f32).at[0, :3 * H].set(b_hh.astype(f32))

    # Time-major, batch zero-padded, flattened to (T*BP, I).
    x_tbi = jnp.transpose(x_bti, (1, 0, 2))
    x_pad = jnp.zeros((T, BP, I), f32).at[:, :B, :].set(x_tbi)
    x2d = x_pad.reshape(T * BP, I)

    # fc: drop the first H columns (they multiply the initial zero hidden block),
    # reshape to per-step (H, O) slices.
    fcw3 = fc_w[:, H:].reshape(O, T, H).transpose(1, 2, 0).astype(f32)   # (T, H, O)
    fcb = fc_b.reshape(1, O).astype(f32)

    inputs = (x2d, wih_f, bih, whh_f, bhh, fcw3, fcb)
    in_specs = [pl.BlockSpec(a.shape, lambda i, nd=a.ndim: (0,) * nd)
                for a in inputs]
    out_spec = pl.BlockSpec((B, O), lambda i: (0, 0))

    return pl.pallas_call(
        grunet_kernel,
        out_shape=jax.ShapeDtypeStruct((B, O), jnp.float32),
        grid=(1,),
        in_specs=in_specs,
        out_specs=out_spec,
        scratch_shapes=[pltpu.VMEM((T * BP, GP), jnp.float32),   # gi
                        pltpu.VMEM((T, BP, H), jnp.float32)],    # hs
        compiler_params=pltpu.CompilerParams(
            dimension_semantics=("arbitrary",)),
    )(*inputs)


def grunet_ref(x_bti, params):
    """Pure-JAX reference that mirrors the PyTorch forward exactly."""
    B, T, _ = x_bti.shape
    w_ih, w_hh = params["w_ih"], params["w_hh"]
    b_ih, b_hh = params["b_ih"], params["b_hh"]
    H = w_hh.shape[1]
    h = jnp.zeros((B, H), jnp.float32)
    hs = [jnp.zeros((B, H), jnp.float32)]                      # h1 initial zeros
    for t in range(T):
        xt = x_bti[:, t, :]
        gi = xt @ w_ih.T + b_ih
        gh = h @ w_hh.T + b_hh
        r = jax.nn.sigmoid(gi[:, :H] + gh[:, :H])
        z = jax.nn.sigmoid(gi[:, H:2 * H] + gh[:, H:2 * H])
        n = jnp.tanh(gi[:, 2 * H:] + r * gh[:, 2 * H:])
        h = (1.0 - z) * n + z * h
        hs.append(h)
    h1 = jnp.concatenate(hs, axis=1)                           # (B, 105*H)
    return h1 @ params["fc_w"].T + params["fc_b"]


def init_params(key, input_dim, hidden_dim, output_dim):
    """Deterministic uniform(-1/sqrt(H), 1/sqrt(H)) init (PyTorch default)."""
    ks = jax.random.split(key, 6)
    bound_g = 1.0 / jnp.sqrt(hidden_dim)
    fc_in = hidden_dim * 105
    bound_f = 1.0 / jnp.sqrt(fc_in)
    u = lambda k, shape, b: jax.random.uniform(
        k, shape, jnp.float32, minval=-b, maxval=b)
    return {
        "w_ih": u(ks[0], (3 * hidden_dim, input_dim), bound_g),
        "w_hh": u(ks[1], (3 * hidden_dim, hidden_dim), bound_g),
        "b_ih": u(ks[2], (3 * hidden_dim,), bound_g),
        "b_hh": u(ks[3], (3 * hidden_dim,), bound_g),
        "fc_w": u(ks[4], (output_dim, fc_in), bound_f),
        "fc_b": u(ks[5], (output_dim,), bound_f),
    }


if __name__ == "__main__":
    B, T = 2, 104            # T = 104 so that concat gives hidden*105 fc input
    INPUT_DIM, HIDDEN_DIM, OUTPUT_DIM = 8, 32, 4

    key = jax.random.PRNGKey(0)
    kx, kp = jax.random.split(key)
    x = jax.random.normal(kx, (B, T, INPUT_DIM), jnp.float32)
    params = init_params(kp, INPUT_DIM, HIDDEN_DIM, OUTPUT_DIM)

    out = grunet_forward(x, params)
    out = jax.block_until_ready(out)

    ref = jax.block_until_ready(grunet_ref(x, params))
    assert out.shape == (B, OUTPUT_DIM)
    assert jnp.allclose(out, ref, atol=2e-4, rtol=2e-4), (out, ref)

    print("KERNEL_OK")
</pallas_src>

<mosaic_0001>
module attributes {stable_mosaic.version = 11 : i64} {
  func.func @grunet_kernel(%arg0: i32, %arg1: memref<832x8xf32, #tpu.memory_space<vmem>>, %arg2: memref<8x128xf32, #tpu.memory_space<vmem>>, %arg3: memref<1x128xf32, #tpu.memory_space<vmem>>, %arg4: memref<32x128xf32, #tpu.memory_space<vmem>>, %arg5: memref<1x128xf32, #tpu.memory_space<vmem>>, %arg6: memref<104x32x4xf32, #tpu.memory_space<vmem>>, %arg7: memref<1x4xf32, #tpu.memory_space<vmem>>, %arg8: memref<2x4xf32, #tpu.memory_space<vmem>>, %arg9: memref<832x128xf32, #tpu.memory_space<vmem>>, %arg10: memref<104x8x32xf32, #tpu.memory_space<vmem>>) attributes {dimension_semantics = [#tpu.dimension_semantics<arbitrary>], iteration_bounds = array<i64: 1>, scalar_prefetch = 0 : i64, scratch_operands = 2 : i64, tpu.core_type = #tpu.core_type<tc>, window_params = [{pipeline_mode = #tpu.pipeline_mode<synchronous>, transform_indices = @transform_0, window_bounds = array<i64: 832, 8>}, {pipeline_mode = #tpu.pipeline_mode<synchronous>, transform_indices = @transform_1, window_bounds = array<i64: 8, 128>}, {pipeline_mode = #tpu.pipeline_mode<synchronous>, transform_indices = @transform_2, window_bounds = array<i64: 1, 128>}, {pipeline_mode = #tpu.pipeline_mode<synchronous>, transform_indices = @transform_3, window_bounds = array<i64: 32, 128>}, {pipeline_mode = #tpu.pipeline_mode<synchronous>, transform_indices = @transform_4, window_bounds = array<i64: 1, 128>}, {pipeline_mode = #tpu.pipeline_mode<synchronous>, transform_indices = @transform_5, window_bounds = array<i64: 104, 32, 4>}, {pipeline_mode = #tpu.pipeline_mode<synchronous>, transform_indices = @transform_6, window_bounds = array<i64: 1, 4>}, {pipeline_mode = #tpu.pipeline_mode<synchronous>, transform_indices = @transform_7, window_bounds = array<i64: 2, 4>}]} {
    %c0 = arith.constant 0 : index
    %c0_0 = arith.constant 0 : index
    %0 = vector.load %arg1[%c0, %c0_0] : memref<832x8xf32, #tpu.memory_space<vmem>>, vector<832x8xf32>
    %c0_1 = arith.constant 0 : index
    %c0_2 = arith.constant 0 : index
    %1 = vector.load %arg2[%c0_1, %c0_2] : memref<8x128xf32, #tpu.memory_space<vmem>>, vector<8x128xf32>
    %cst = arith.constant dense<0.000000e+00> : vector<832x128xf32>
    %2 = tpu.matmul %0, %1, %cst {dimension_numbers = #tpu.dot_dimension_numbers<[1], [0], [0], [1], [0, 0, 1, 1], [], []>} : vector<832x8xf32>, vector<8x128xf32>, vector<832x128xf32> -> vector<832x128xf32>
    %c0_3 = arith.constant 0 : index
    %c0_4 = arith.constant 0 : index
    %3 = vector.load %arg3[%c0_3, %c0_4] : memref<1x128xf32, #tpu.memory_space<vmem>>, vector<1x128xf32>
    %4 = vector.broadcast %3 : vector<1x128xf32> to vector<832x128xf32>
    %5 = arith.addf %2, %4 : vector<832x128xf32>
    %c0_5 = arith.constant 0 : index
    %c0_6 = arith.constant 0 : index
    %6 = vector.load %arg9[%c0_5, %c0_6] : memref<832x128xf32, #tpu.memory_space<vmem>>, vector<832x128xf32>
    tpu.vector_store %arg9[%c0_5, %c0_6], %5 {strides = array<i32>} : memref<832x128xf32, #tpu.memory_space<vmem>>, vector<832x128xf32>,
    %c0_7 = arith.constant 0 : index
    %c0_8 = arith.constant 0 : index
    %7 = vector.load %arg4[%c0_7, %c0_8] : memref<32x128xf32, #tpu.memory_space<vmem>>, vector<32x128xf32>
    %c0_9 = arith.constant 0 : index
    %c0_10 = arith.constant 0 : index
    %8 = vector.load %arg5[%c0_9, %c0_10] : memref<1x128xf32, #tpu.memory_space<vmem>>, vector<1x128xf32>
    %cst_11 = arith.constant 0.000000e+00 : f32
    %9 = vector.broadcast %cst_11 : f32 to vector<8x32xf32>
    %c0_i32 = arith.constant 0 : i32
    %c13_i32 = arith.constant 13 : i32
    %10 = arith.addi %c0_i32, %c13_i32 : i32
    %c1_i32 = arith.constant 1 : i32
    %11 = scf.for %arg11 = %c0_i32 to %10 step %c1_i32 iter_args(%arg12 = %9) -> (vector<8x32xf32>)  : i32 {
      %c8_i32 = arith.constant 8 : i32
      %20 = arith.muli %arg11, %c8_i32 : i32
      %c0_i32_22 = arith.constant 0 : i32
      %21 = arith.addi %20, %c0_i32_22 : i32
      %c8_i32_23 = arith.constant 8 : i32
      %22 = arith.muli %21, %c8_i32_23 : i32
      %23 = tpu.assume_multiple %22, 8 : i32
      %24 = arith.index_cast %23 : i32 to index
      %c0_24 = arith.constant 0 : index
      %25 = vector.load %arg9[%24, %c0_24] : memref<832x128xf32, #tpu.memory_space<vmem>>, vector<8x128xf32>
      %cst_25 = arith.constant dense<0.000000e+00> : vector<8x128xf32>
      %26 = tpu.matmul %arg12, %7, %cst_25 {dimension_numbers = #tpu.dot_dimension_numbers<[1], [0], [0], [1], [0, 0, 1, 1], [], []>} : vector<8x32xf32>, vector<32x128xf32>, vector<8x128xf32> -> vector<8x128xf32>
      %27 = vector.broadcast %8 : vector<1x128xf32> to vector<8x128xf32>
      %28 = arith.addf %26, %27 : vector<8x128xf32>
      %29 = vector.extract_strided_slice %25 {offsets = [0, 0], sizes = [8, 32], strides = [1, 1]} : vector<8x128xf32> to vector<8x32xf32>
      %30 = vector.extract_strided_slice %28 {offsets = [0, 0], sizes = [8, 32], strides = [1, 1]} : vector<8x128xf32> to vector<8x32xf32>
      %31 = arith.addf %29, %30 : vector<8x32xf32>
      %32 = arith.negf %31 : vector<8x32xf32>
      %33 = math.exp %32 : vector<8x32xf32>
      %cst_26 = arith.constant 1.000000e+00 : f32
      %34 = vector.broadcast %cst_26 : f32 to vector<8x32xf32>
      %35 = arith.addf %34, %33 : vector<8x32xf32>
      %36 = arith.divf %34, %35 : vector<8x32xf32>
      %37 = vector.extract_strided_slice %25 {offsets = [0, 32], sizes = [8, 32], strides = [1, 1]} : vector<8x128xf32> to vector<8x32xf32>
      %38 = vector.extract_strided_slice %28 {offsets = [0, 32], sizes = [8, 32], strides = [1, 1]} : vector<8x128xf32> to vector<8x32xf32>
      %39 = arith.addf %37, %38 : vector<8x32xf32>
      %40 = arith.negf %39 : vector<8x32xf32>
      %41 = math.exp %40 : vector<8x32xf32>
      %cst_27 = arith.constant 1.000000e+00 : f32
      %42 = vector.broadcast %cst_27 : f32 to vector<8x32xf32>
      %43 = arith.addf %42, %41 : vector<8x32xf32>
      %44 = arith.divf %42, %43 : vector<8x32xf32>
      %45 = vector.extract_strided_slice %25 {offsets = [0, 64], sizes = [8, 32], strides = [1, 1]} : vector<8x128xf32> to vector<8x32xf32>
      %46 = vector.extract_strided_slice %28 {offsets = [0, 64], sizes = [8, 32], strides = [1, 1]} : vector<8x128xf32> to vector<8x32xf32>
      %47 = arith.mulf %36, %46 : vector<8x32xf32>
      %48 = arith.addf %45, %47 : vector<8x32xf32>
      %49 = math.tanh %48 : vector<8x32xf32>
      %cst_28 = arith.constant 1.000000e+00 : f32
      %50 = vector.broadcast %cst_28 : f32 to vector<8x32xf32>
      %51 = arith.subf %50, %44 : vector<8x32xf32>
      %52 = arith.mulf %51, %49 : vector<8x32xf32>
      %53 = arith.mulf %44, %arg12 : vector<8x32xf32>
      %54 = arith.addf %52, %53 : vector<8x32xf32>
      %55 = arith.index_cast %21 : i32 to index
      %c0_29 = arith.constant 0 : index
      %c0_30 = arith.constant 0 : index
      %56 = vector.load %arg10[%55, %c0_29, %c0_30] : memref<104x8x32xf32, #tpu.memory_space<vmem>>, vector<1x8x32xf32>
      %57 = vector.shape_cast %56 : vector<1x8x32xf32> to vector<8x32xf32>
      %58 = vector.shape_cast %54 : vector<8x32xf32> to vector<1x8x32xf32>
      tpu.vector_store %arg10[%55, %c0_29, %c0_30], %58 {strides = array<i32>} : memref<104x8x32xf32, #tpu.memory_space<vmem>>, vector<1x8x32xf32>,
      %c8_i32_31 = arith.constant 8 : i32
      %59 = arith.muli %arg11, %c8_i32_31 : i32
      %c1_i32_32 = arith.constant 1 : i32
      %60 = arith.addi %59, %c1_i32_32 : i32
      %c8_i32_33 = arith.constant 8 : i32
      %61 = arith.muli %60, %c8_i32_33 : i32
      %62 = tpu.assume_multiple %61, 8 : i32
      %63 = arith.index_cast %62 : i32 to index
      %c0_34 = arith.constant 0 : index
      %64 = vector.load %arg9[%63, %c0_34] : memref<832x128xf32, #tpu.memory_space<vmem>>, vector<8x128xf32>
      %cst_35 = arith.constant dense<0.000000e+00> : vector<8x128xf32>
      %65 = tpu.matmul %54, %7, %cst_35 {dimension_numbers = #tpu.dot_dimension_numbers<[1], [0], [0], [1], [0, 0, 1, 1], [], []>} : vector<8x32xf32>, vector<32x128xf32>, vector<8x128xf32> -> vector<8x128xf32>
      %66 = vector.broadcast %8 : vector<1x128xf32> to vector<8x128xf32>
      %67 = arith.addf %65, %66 : vector<8x128xf32>
      %68 = vector.extract_strided_slice %64 {offsets = [0, 0], sizes = [8, 32], strides = [1, 1]} : vector<8x128xf32> to vector<8x32xf32>
      %69 = vector.extract_strided_slice %67 {offsets = [0, 0], sizes = [8, 32], strides = [1, 1]} : vector<8x128xf32> to vector<8x32xf32>
      %70 = arith.addf %68, %69 : vector<8x32xf32>
      %71 = arith.negf %70 : vector<8x32xf32>
      %72 = math.exp %71 : vector<8x32xf32>
      %cst_36 = arith.constant 1.000000e+00 : f32
      %73 = vector.broadcast %cst_36 : f32 to vector<8x32xf32>
      %74 = arith.addf %73, %72 : vector<8x32xf32>
      %75 = arith.divf %73, %74 : vector<8x32xf32>
      %76 = vector.extract_strided_slice %64 {offsets = [0, 32], sizes = [8, 32], strides = [1, 1]} : vector<8x128xf32> to vector<8x32xf32>
      %77 = vector.extract_strided_slice %67 {offsets = [0, 32], sizes = [8, 32], strides = [1, 1]} : vector<8x128xf32> to vector<8x32xf32>
      %78 = arith.addf %76, %77 : vector<8x32xf32>
      %79 = arith.negf %78 : vector<8x32xf32>
      %80 = math.exp %79 : vector<8x32xf32>
      %cst_37 = arith.constant 1.000000e+00 : f32
      %81 = vector.broadcast %cst_37 : f32 to vector<8x32xf32>
      %82 = arith.addf %81, %80 : vector<8x32xf32>
      %83 = arith.divf %81, %82 : vector<8x32xf32>
      %84 = vector.extract_strided_slice %64 {offsets = [0, 64], sizes = [8, 32], strides = [1, 1]} : vector<8x128xf32> to vector<8x32xf32>
      %85 = vector.extract_strided_slice %67 {offsets = [0, 64], sizes = [8, 32], strides = [1, 1]} : vector<8x128xf32> to vector<8x32xf32>
      %86 = arith.mulf %75, %85 : vector<8x32xf32>
      %87 = arith.addf %84, %86 : vector<8x32xf32>
      %88 = math.tanh %87 : vector<8x32xf32>
      %cst_38 = arith.constant 1.000000e+00 : f32
      %89 = vector.broadcast %cst_38 : f32 to vector<8x32xf32>
      %90 = arith.subf %89, %83 : vector<8x32xf32>
      %91 = arith.mulf %90, %88 : vector<8x32xf32>
      %92 = arith.mulf %83, %54 : vector<8x32xf32>
      %93 = arith.addf %91, %92 : vector<8x32xf32>
      %94 = arith.index_cast %60 : i32 to index
      %c0_39 = arith.constant 0 : index
      %c0_40 = arith.constant 0 : index
      %95 = vector.load %arg10[%94, %c0_39, %c0_40] : memref<104x8x32xf32, #tpu.memory_space<vmem>>, vector<1x8x32xf32>
      %96 = vector.shape_cast %95 : vector<1x8x32xf32> to vector<8x32xf32>
      %97 = vector.shape_cast %93 : vector<8x32xf32> to vector<1x8x32xf32>
      tpu.vector_store %arg10[%94, %c0_39, %c0_40], %97 {strides = array<i32>} : memref<104x8x32xf32, #tpu.memory_space<vmem>>, vector<1x8x32xf32>,
      %c8_i32_41 = arith.constant 8 : i32
      %98 = arith.muli %arg11, %c8_i32_41 : i32
      %c2_i32 = arith.constant 2 : i32
      %99 = arith.addi %98, %c2_i32 : i32
      %c8_i32_42 = arith.constant 8 : i32
      %100 = arith.muli %99, %c8_i32_42 : i32
      %101 = tpu.assume_multiple %100, 8 : i32
      %102 = arith.index_cast %101 : i32 to index
      %c0_43 = arith.constant 0 : index
      %103 = vector.load %arg9[%102, %c0_43] : memref<832x128xf32, #tpu.memory_space<vmem>>, vector<8x128xf32>
      %cst_44 = arith.constant dense<0.000000e+00> : vector<8x128xf32>
      %104 = tpu.matmul %93, %7, %cst_44 {dimension_numbers = #tpu.dot_dimension_numbers<[1], [0], [0], [1], [0, 0, 1, 1], [], []>} : vector<8x32xf32>, vector<32x128xf32>, vector<8x128xf32> -> vector<8x128xf32>
      %105 = vector.broadcast %8 : vector<1x128xf32> to vector<8x128xf32>
      %106 = arith.addf %104, %105 : vector<8x128xf32>
      %107 = vector.extract_strided_slice %103 {offsets = [0, 0], sizes = [8, 32], strides = [1, 1]} : vector<8x128xf32> to vector<8x32xf32>
      %108 = vector.extract_strided_slice %106 {offsets = [0, 0], sizes = [8, 32], strides = [1, 1]} : vector<8x128xf32> to vector<8x32xf32>
      %109 = arith.addf %107, %108 : vector<8x32xf32>
      %110 = arith.negf %109 : vector<8x32xf32>
      %111 = math.exp %110 : vector<8x32xf32>
      %cst_45 = arith.constant 1.000000e+00 : f32
      %112 = vector.broadcast %cst_45 : f32 to vector<8x32xf32>
      %113 = arith.addf %112, %111 : vector<8x32xf32>
      %114 = arith.divf %112, %113 : vector<8x32xf32>
      %115 = vector.extract_strided_slice %103 {offsets = [0, 32], sizes = [8, 32], strides = [1, 1]} : vector<8x128xf32> to vector<8x32xf32>
      %116 = vector.extract_strided_slice %106 {offsets = [0, 32], sizes = [8, 32], strides = [1, 1]} : vector<8x128xf32> to vector<8x32xf32>
      %117 = arith.addf %115, %116 : vector<8x32xf32>
      %118 = arith.negf %117 : vector<8x32xf32>
      %119 = math.exp %118 : vector<8x32xf32>
      %cst_46 = arith.constant 1.000000e+00 : f32
      %120 = vector.broadcast %cst_46 : f32 to vector<8x32xf32>
      %121 = arith.addf %120, %119 : vector<8x32xf32>
      %122 = arith.divf %120, %121 : vector<8x32xf32>
      %123 = vector.extract_strided_slice %103 {offsets = [0, 64], sizes = [8, 32], strides = [1, 1]} : vector<8x128xf32> to vector<8x32xf32>
      %124 = vector.extract_strided_slice %106 {offsets = [0, 64], sizes = [8, 32], strides = [1, 1]} : vector<8x128xf32> to vector<8x32xf32>
      %125 = arith.mulf %114, %124 : vector<8x32xf32>
      %126 = arith.addf %123, %125 : vector<8x32xf32>
      %127 = math.tanh %126 : vector<8x32xf32>
      %cst_47 = arith.constant 1.000000e+00 : f32
      %128 = vector.broadcast %cst_47 : f32 to vector<8x32xf32>
      %129 = arith.subf %128, %122 : vector<8x32xf32>
      %130 = arith.mulf %129, %127 : vector<8x32xf32>
      %131 = arith.mulf %122, %93 : vector<8x32xf32>
      %132 = arith.addf %130, %131 : vector<8x32xf32>
      %133 = arith.index_cast %99 : i32 to index
      %c0_48 = arith.constant 0 : index
      %c0_49 = arith.constant 0 : index
      %134 = vector.load %arg10[%133, %c0_48, %c0_49] : memref<104x8x32xf32, #tpu.memory_space<vmem>>, vector<1x8x32xf32>
      %135 = vector.shape_cast %134 : vector<1x8x32xf32> to vector<8x32xf32>
      %136 = vector.shape_cast %132 : vector<8x32xf32> to vector<1x8x32xf32>
      tpu.vector_store %arg10[%133, %c0_48, %c0_49], %136 {strides = array<i32>} : memref<104x8x32xf32, #tpu.memory_space<vmem>>, vector<1x8x32xf32>,
      %c8_i32_50 = arith.constant 8 : i32
      %137 = arith.muli %arg11, %c8_i32_50 : i32
      %c3_i32 = arith.constant 3 : i32
      %138 = arith.addi %137, %c3_i32 : i32
      %c8_i32_51 = arith.constant 8 : i32
      %139 = arith.muli %138, %c8_i32_51 : i32
      %140 = tpu.assume_multiple %139, 8 : i32
      %141 = arith.index_cast %140 : i32 to index
      %c0_52 = arith.constant 0 : index
      %142 = vector.load %arg9[%141, %c0_52] : memref<832x128xf32, #tpu.memory_space<vmem>>, vector<8x128xf32>
      %cst_53 = arith.constant dense<0.000000e+00> : vector<8x128xf32>
      %143 = tpu.matmul %132, %7, %cst_53 {dimension_numbers = #tpu.dot_dimension_numbers<[1], [0], [0], [1], [0, 0, 1, 1], [], []>} : vector<8x32xf32>, vector<32x128xf32>, vector<8x128xf32> -> vector<8x128xf32>
      %144 = vector.broadcast %8 : vector<1x128xf32> to vector<8x128xf32>
      %145 = arith.addf %143, %144 : vector<8x128xf32>
      %146 = vector.extract_strided_slice %142 {offsets = [0, 0], sizes = [8, 32], strides = [1, 1]} : vector<8x128xf32> to vector<8x32xf32>
      %147 = vector.extract_strided_slice %145 {offsets = [0, 0], sizes = [8, 32], strides = [1, 1]} : vector<8x128xf32> to vector<8x32xf32>
      %148 = arith.addf %146, %147 : vector<8x32xf32>
      %149 = arith.negf %148 : vector<8x32xf32>
      %150 = math.exp %149 : vector<8x32xf32>
      %cst_54 = arith.constant 1.000000e+00 : f32
      %151 = vector.broadcast %cst_54 : f32 to vector<8x32xf32>
      %152 = arith.addf %151, %150 : vector<8x32xf32>
      %153 = arith.divf %151, %152 : vector<8x32xf32>
      %154 = vector.extract_strided_slice %142 {offsets = [0, 32], sizes = [8, 32], strides = [1, 1]} : vector<8x128xf32> to vector<8x32xf32>
      %155 = vector.extract_strided_slice %145 {offsets = [0, 32], sizes = [8, 32], strides = [1, 1]} : vector<8x128xf32> to vector<8x32xf32>
      %156 = arith.addf %154, %155 : vector<8x32xf32>
      %157 = arith.negf %156 : vector<8x32xf32>
      %158 = math.exp %157 : vector<8x32xf32>
      %cst_55 = arith.constant 1.000000e+00 : f32
      %159 = vector.broadcast %cst_55 : f32 to vector<8x32xf32>
      %160 = arith.addf %159, %158 : vector<8x32xf32>
      %161 = arith.divf %159, %160 : vector<8x32xf32>
      %162 = vector.extract_strided_slice %142 {offsets = [0, 64], sizes = [8, 32], strides = [1, 1]} : vector<8x128xf32> to vector<8x32xf32>
      %163 = vector.extract_strided_slice %145 {offsets = [0, 64], sizes = [8, 32], strides = [1, 1]} : vector<8x128xf32> to vector<8x32xf32>
      %164 = arith.mulf %153, %163 : vector<8x32xf32>
      %165 = arith.addf %162, %164 : vector<8x32xf32>
      %166 = math.tanh %165 : vector<8x32xf32>
      %cst_56 = arith.constant 1.000000e+00 : f32
      %167 = vector.broadcast %cst_56 : f32 to vector<8x32xf32>
      %168 = arith.subf %167, %161 : vector<8x32xf32>
      %169 = arith.mulf %168, %166 : vector<8x32xf32>
      %170 = arith.mulf %161, %132 : vector<8x32xf32>
      %171 = arith.addf %169, %170 : vector<8x32xf32>
      %172 = arith.index_cast %138 : i32 to index
      %c0_57 = arith.constant 0 : index
      %c0_58 = arith.constant 0 : index
      %173 = vector.load %arg10[%172, %c0_57, %c0_58] : memref<104x8x32xf32, #tpu.memory_space<vmem>>, vector<1x8x32xf32>
      %174 = vector.shape_cast %173 : vector<1x8x32xf32> to vector<8x32xf32>
      %175 = vector.shape_cast %171 : vector<8x32xf32> to vector<1x8x32xf32>
      tpu.vector_store %arg10[%172, %c0_57, %c0_58], %175 {strides = array<i32>} : memref<104x8x32xf32, #tpu.memory_space<vmem>>, vector<1x8x32xf32>,
      %c8_i32_59 = arith.constant 8 : i32
      %176 = arith.muli %arg11, %c8_i32_59 : i32
      %c4_i32 = arith.constant 4 : i32
      %177 = arith.addi %176, %c4_i32 : i32
      %c8_i32_60 = arith.constant 8 : i32
      %178 = arith.muli %177, %c8_i32_60 : i32
      %179 = tpu.assume_multiple %178, 8 : i32
      %180 = arith.index_cast %179 : i32 to index
      %c0_61 = arith.constant 0 : index
      %181 = vector.load %arg9[%180, %c0_61] : memref<832x128xf32, #tpu.memory_space<vmem>>, vector<8x128xf32>
      %cst_62 = arith.constant dense<0.000000e+00> : vector<8x128xf32>
      %182 = tpu.matmul %171, %7, %cst_62 {dimension_numbers = #tpu.dot_dimension_numbers<[1], [0], [0], [1], [0, 0, 1, 1], [], []>} : vector<8x32xf32>, vector<32x128xf32>, vector<8x128xf32> -> vector<8x128xf32>
      %183 = vector.broadcast %8 : vector<1x128xf32> to vector<8x128xf32>
      %184 = arith.addf %182, %183 : vector<8x128xf32>
      %185 = vector.extract_strided_slice %181 {offsets = [0, 0], sizes = [8, 32], strides = [1, 1]} : vector<8x128xf32> to vector<8x32xf32>
      %186 = vector.extract_strided_slice %184 {offsets = [0, 0], sizes = [8, 32], strides = [1, 1]} : vector<8x128xf32> to vector<8x32xf32>
      %187 = arith.addf %185, %186 : vector<8x32xf32>
      %188 = arith.negf %187 : vector<8x32xf32>
      %189 = math.exp %188 : vector<8x32xf32>
      %cst_63 = arith.constant 1.000000e+00 : f32
      %190 = vector.broadcast %cst_63 : f32 to vector<8x32xf32>
      %191 = arith.addf %190, %189 : vector<8x32xf32>
      %192 = arith.divf %190, %191 : vector<8x32xf32>
      %193 = vector.extract_strided_slice %181 {offsets = [0, 32], sizes = [8, 32], strides = [1, 1]} : vector<8x128xf32> to vector<8x32xf32>
      %194 = vector.extract_strided_slice %184 {offsets = [0, 32], sizes = [8, 32], strides = [1, 1]} : vector<8x128xf32> to vector<8x32xf32>
      %195 = arith.addf %193, %194 : vector<8x32xf32>
      %196 = arith.negf %195 : vector<8x32xf32>
      %197 = math.exp %196 : vector<8x32xf32>
      %cst_64 = arith.constant 1.000000e+00 : f32
      %198 = vector.broadcast %cst_64 : f32 to vector<8x32xf32>
      %199 = arith.addf %198, %197 : vector<8x32xf32>
      %200 = arith.divf %198, %199 : vector<8x32xf32>
      %201 = vector.extract_strided_slice %181 {offsets = [0, 64], sizes = [8, 32], strides = [1, 1]} : vector<8x128xf32> to vector<8x32xf32>
      %202 = vector.extract_strided_slice %184 {offsets = [0, 64], sizes = [8, 32], strides = [1, 1]} : vector<8x128xf32> to vector<8x32xf32>
      %203 = arith.mulf %192, %202 : vector<8x32xf32>
      %204 = arith.addf %201, %203 : vector<8x32xf32>
      %205 = math.tanh %204 : vector<8x32xf32>
      %cst_65 = arith.constant 1.000000e+00 : f32
      %206 = vector.broadcast %cst_65 : f32 to vector<8x32xf32>
      %207 = arith.subf %206, %200 : vector<8x32xf32>
      %208 = arith.mulf %207, %205 : vector<8x32xf32>
      %209 = arith.mulf %200, %171 : vector<8x32xf32>
      %210 = arith.addf %208, %209 : vector<8x32xf32>
      %211 = arith.index_cast %177 : i32 to index
      %c0_66 = arith.constant 0 : index
      %c0_67 = arith.constant 0 : index
      %212 = vector.load %arg10[%211, %c0_66, %c0_67] : memref<104x8x32xf32, #tpu.memory_space<vmem>>, vector<1x8x32xf32>
      %213 = vector.shape_cast %212 : vector<1x8x32xf32> to vector<8x32xf32>
      %214 = vector.shape_cast %210 : vector<8x32xf32> to vector<1x8x32xf32>
      tpu.vector_store %arg10[%211, %c0_66, %c0_67], %214 {strides = array<i32>} : memref<104x8x32xf32, #tpu.memory_space<vmem>>, vector<1x8x32xf32>,
      %c8_i32_68 = arith.constant 8 : i32
      %215 = arith.muli %arg11, %c8_i32_68 : i32
      %c5_i32 = arith.constant 5 : i32
      %216 = arith.addi %215, %c5_i32 : i32
      %c8_i32_69 = arith.constant 8 : i32
      %217 = arith.muli %216, %c8_i32_69 : i32
      %218 = tpu.assume_multiple %217, 8 : i32
      %219 = arith.index_cast %218 : i32 to index
      %c0_70 = arith.constant 0 : index
      %220 = vector.load %arg9[%219, %c0_70] : memref<832x128xf32, #tpu.memory_space<vmem>>, vector<8x128xf32>
      %cst_71 = arith.constant dense<0.000000e+00> : vector<8x128xf32>
      %221 = tpu.matmul %210, %7, %cst_71 {dimension_numbers = #tpu.dot_dimension_numbers<[1], [0], [0], [1], [0, 0, 1, 1], [], []>} : vector<8x32xf32>, vector<32x128xf32>, vector<8x128xf32> -> vector<8x128xf32>
      %222 = vector.broadcast %8 : vector<1x128xf32> to vector<8x128xf32>
      %223 = arith.addf %221, %222 : vector<8x128xf32>
      %224 = vector.extract_strided_slice %220 {offsets = [0, 0], sizes = [8, 32], strides = [1, 1]} : vector<8x128xf32> to vector<8x32xf32>
      %225 = vector.extract_strided_slice %223 {offsets = [0, 0], sizes = [8, 32], strides = [1, 1]} : vector<8x128xf32> to vector<8x32xf32>
      %226 = arith.addf %224, %225 : vector<8x32xf32>
      %227 = arith.negf %226 : vector<8x32xf32>
      %228 = math.exp %227 : vector<8x32xf32>
      %cst_72 = arith.constant 1.000000e+00 : f32
      %229 = vector.broadcast %cst_72 : f32 to vector<8x32xf32>
      %230 = arith.addf %229, %228 : vector<8x32xf32>
      %231 = arith.divf %229, %230 : vector<8x32xf32>
      %232 = vector.extract_strided_slice %220 {offsets = [0, 32], sizes = [8, 32], strides = [1, 1]} : vector<8x128xf32> to vector<8x32xf32>
      %233 = vector.extract_strided_slice %223 {offsets = [0, 32], sizes = [8, 32], strides = [1, 1]} : vector<8x128xf32> to vector<8x32xf32>
      %234 = arith.addf %232, %233 : vector<8x32xf32>
      %235 = arith.negf %234 : vector<8x32xf32>
      %236 = math.exp %235 : vector<8x32xf32>
      %cst_73 = arith.constant 1.000000e+00 : f32
      %237 = vector.broadcast %cst_73 : f32 to vector<8x32xf32>
      %238 = arith.addf %237, %236 : vector<8x32xf32>
      %239 = arith.divf %237, %238 : vector<8x32xf32>
      %240 = vector.extract_strided_slice %220 {offsets = [0, 64], sizes = [8, 32], strides = [1, 1]} : vector<8x128xf32> to vector<8x32xf32>
      %241 = vector.extract_strided_slice %223 {offsets = [0, 64], sizes = [8, 32], strides = [1, 1]} : vector<8x128xf32> to vector<8x32xf32>
      %242 = arith.mulf %231, %241 : vector<8x32xf32>
      %243 = arith.addf %240, %242 : vector<8x32xf32>
      %244 = math.tanh %243 : vector<8x32xf32>
      %cst_74 = arith.constant 1.000000e+00 : f32
      %245 = vector.broadcast %cst_74 : f32 to vector<8x32xf32>
      %246 = arith.subf %245, %239 : vector<8x32xf32>
      %247 = arith.mulf %246, %244 : vector<8x32xf32>
      %248 = arith.mulf %239, %210 : vector<8x32xf32>
      %249 = arith.addf %247, %248 : vector<8x32xf32>
      %250 = arith.index_cast %216 : i32 to index
      %c0_75 = arith.constant 0 : index
      %c0_76 = arith.constant 0 : index
      %251 = vector.load %arg10[%250, %c0_75, %c0_76] : memref<104x8x32xf32, #tpu.memory_space<vmem>>, vector<1x8x32xf32>
      %252 = vector.shape_cast %251 : vector<1x8x32xf32> to vector<8x32xf32>
      %253 = vector.shape_cast %249 : vector<8x32xf32> to vector<1x8x32xf32>
      tpu.vector_store %arg10[%250, %c0_75, %c0_76], %253 {strides = array<i32>} : memref<104x8x32xf32, #tpu.memory_space<vmem>>, vector<1x8x32xf32>,
      %c8_i32_77 = arith.constant 8 : i32
      %254 = arith.muli %arg11, %c8_i32_77 : i32
      %c6_i32 = arith.constant 6 : i32
      %255 = arith.addi %254, %c6_i32 : i32
      %c8_i32_78 = arith.constant 8 : i32
      %256 = arith.muli %255, %c8_i32_78 : i32
      %257 = tpu.assume_multiple %256, 8 : i32
      %258 = arith.index_cast %257 : i32 to index
      %c0_79 = arith.constant 0 : index
      %259 = vector.load %arg9[%258, %c0_79] : memref<832x128xf32, #tpu.memory_space<vmem>>, vector<8x128xf32>
      %cst_80 = arith.constant dense<0.000000e+00> : vector<8x128xf32>
      %260 = tpu.matmul %249, %7, %cst_80 {dimension_numbers = #tpu.dot_dimension_numbers<[1], [0], [0], [1], [0, 0, 1, 1], [], []>} : vector<8x32xf32>, vector<32x128xf32>, vector<8x128xf32> -> vector<8x128xf32>
      %261 = vector.broadcast %8 : vector<1x128xf32> to vector<8x128xf32>
      %262 = arith.addf %260, %261 : vector<8x128xf32>
      %263 = vector.extract_strided_slice %259 {offsets = [0, 0], sizes = [8, 32], strides = [1, 1]} : vector<8x128xf32> to vector<8x32xf32>
      %264 = vector.extract_strided_slice %262 {offsets = [0, 0], sizes = [8, 32], strides = [1, 1]} : vector<8x128xf32> to vector<8x32xf32>
      %265 = arith.addf %263, %264 : vector<8x32xf32>
      %266 = arith.negf %265 : vector<8x32xf32>
      %267 = math.exp %266 : vector<8x32xf32>
      %cst_81 = arith.constant 1.000000e+00 : f32
      %268 = vector.broadcast %cst_81 : f32 to vector<8x32xf32>
      %269 = arith.addf %268, %267 : vector<8x32xf32>
      %270 = arith.divf %268, %269 : vector<8x32xf32>
      %271 = vector.extract_strided_slice %259 {offsets = [0, 32], sizes = [8, 32], strides = [1, 1]} : vector<8x128xf32> to vector<8x32xf32>
      %272 = vector.extract_strided_slice %262 {offsets = [0, 32], sizes = [8, 32], strides = [1, 1]} : vector<8x128xf32> to vector<8x32xf32>
      %273 = arith.addf %271, %272 : vector<8x32xf32>
      %274 = arith.negf %273 : vector<8x32xf32>
      %275 = math.exp %274 : vector<8x32xf32>
      %cst_82 = arith.constant 1.000000e+00 : f32
      %276 = vector.broadcast %cst_82 : f32 to vector<8x32xf32>
      %277 = arith.addf %276, %275 : vector<8x32xf32>
      %278 = arith.divf %276, %277 : vector<8x32xf32>
      %279 = vector.extract_strided_slice %259 {offsets = [0, 64], sizes = [8, 32], strides = [1, 1]} : vector<8x128xf32> to vector<8x32xf32>
      %280 = vector.extract_strided_slice %262 {offsets = [0, 64], sizes = [8, 32], strides = [1, 1]} : vector<8x128xf32> to vector<8x32xf32>
      %281 = arith.mulf %270, %280 : vector<8x32xf32>
      %282 = arith.addf %279, %281 : vector<8x32xf32>
      %283 = math.tanh %282 : vector<8x32xf32>
      %cst_83 = arith.constant 1.000000e+00 : f32
      %284 = vector.broadcast %cst_83 : f32 to vector<8x32xf32>
      %285 = arith.subf %284, %278 : vector<8x32xf32>
      %286 = arith.mulf %285, %283 : vector<8x32xf32>
      %287 = arith.mulf %278, %249 : vector<8x32xf32>
      %288 = arith.addf %286, %287 : vector<8x32xf32>
      %289 = arith.index_cast %255 : i32 to index
      %c0_84 = arith.constant 0 : index
      %c0_85 = arith.constant 0 : index
      %290 = vector.load %arg10[%289, %c0_84, %c0_85] : memref<104x8x32xf32, #tpu.memory_space<vmem>>, vector<1x8x32xf32>
      %291 = vector.shape_cast %290 : vector<1x8x32xf32> to vector<8x32xf32>
      %292 = vector.shape_cast %288 : vector<8x32xf32> to vector<1x8x32xf32>
      tpu.vector_store %arg10[%289, %c0_84, %c0_85], %292 {strides = array<i32>} : memref<104x8x32xf32, #tpu.memory_space<vmem>>, vector<1x8x32xf32>,
      %c8_i32_86 = arith.constant 8 : i32
      %293 = arith.muli %arg11, %c8_i32_86 : i32
      %c7_i32 = arith.constant 7 : i32
      %294 = arith.addi %293, %c7_i32 : i32
      %c8_i32_87 = arith.constant 8 : i32
      %295 = arith.muli %294, %c8_i32_87 : i32
      %296 = tpu.assume_multiple %295, 8 : i32
      %297 = arith.index_cast %296 : i32 to index
      %c0_88 = arith.constant 0 : index
      %298 = vector.load %arg9[%297, %c0_88] : memref<832x128xf32, #tpu.memory_space<vmem>>, vector<8x128xf32>
      %cst_89 = arith.constant dense<0.000000e+00> : vector<8x128xf32>
      %299 = tpu.matmul %288, %7, %cst_89 {dimension_numbers = #tpu.dot_dimension_numbers<[1], [0], [0], [1], [0, 0, 1, 1], [], []>} : vector<8x32xf32>, vector<32x128xf32>, vector<8x128xf32> -> vector<8x128xf32>
      %300 = vector.broadcast %8 : vector<1x128xf32> to vector<8x128xf32>
      %301 = arith.addf %299, %300 : vector<8x128xf32>
      %302 = vector.extract_strided_slice %298 {offsets = [0, 0], sizes = [8, 32], strides = [1, 1]} : vector<8x128xf32> to vector<8x32xf32>
      %303 = vector.extract_strided_slice %301 {offsets = [0, 0], sizes = [8, 32], strides = [1, 1]} : vector<8x128xf32> to vector<8x32xf32>
      %304 = arith.addf %302, %303 : vector<8x32xf32>
      %305 = arith.negf %304 : vector<8x32xf32>
      %306 = math.exp %305 : vector<8x32xf32>
      %cst_90 = arith.constant 1.000000e+00 : f32
      %307 = vector.broadcast %cst_90 : f32 to vector<8x32xf32>
      %308 = arith.addf %307, %306 : vector<8x32xf32>
      %309 = arith.divf %307, %308 : vector<8x32xf32>
      %310 = vector.extract_strided_slice %298 {offsets = [0, 32], sizes = [8, 32], strides = [1, 1]} : vector<8x128xf32> to vector<8x32xf32>
      %311 = vector.extract_strided_slice %301 {offsets = [0, 32], sizes = [8, 32], strides = [1, 1]} : vector<8x128xf32> to vector<8x32xf32>
      %312 = arith.addf %310, %311 : vector<8x32xf32>
      %313 = arith.negf %312 : vector<8x32xf32>
      %314 = math.exp %313 : vector<8x32xf32>
      %cst_91 = arith.constant 1.000000e+00 : f32
      %315 = vector.broadcast %cst_91 : f32 to vector<8x32xf32>
      %316 = arith.addf %315, %314 : vector<8x32xf32>
      %317 = arith.divf %315, %316 : vector<8x32xf32>
      %318 = vector.extract_strided_slice %298 {offsets = [0, 64], sizes = [8, 32], strides = [1, 1]} : vector<8x128xf32> to vector<8x32xf32>
      %319 = vector.extract_strided_slice %301 {offsets = [0, 64], sizes = [8, 32], strides = [1, 1]} : vector<8x128xf32> to vector<8x32xf32>
      %320 = arith.mulf %309, %319 : vector<8x32xf32>
      %321 = arith.addf %318, %320 : vector<8x32xf32>
      %322 = math.tanh %321 : vector<8x32xf32>
      %cst_92 = arith.constant 1.000000e+00 : f32
      %323 = vector.broadcast %cst_92 : f32 to vector<8x32xf32>
      %324 = arith.subf %323, %317 : vector<8x32xf32>
      %325 = arith.mulf %324, %322 : vector<8x32xf32>
      %326 = arith.mulf %317, %288 : vector<8x32xf32>
      %327 = arith.addf %325, %326 : vector<8x32xf32>
      %328 = arith.index_cast %294 : i32 to index
      %c0_93 = arith.constant 0 : index
      %c0_94 = arith.constant 0 : index
      %329 = vector.load %arg10[%328, %c0_93, %c0_94] : memref<104x8x32xf32, #tpu.memory_space<vmem>>, vector<1x8x32xf32>
      %330 = vector.shape_cast %329 : vector<1x8x32xf32> to vector<8x32xf32>
      %331 = vector.shape_cast %327 : vector<8x32xf32> to vector<1x8x32xf32>
      tpu.vector_store %arg10[%328, %c0_93, %c0_94], %331 {strides = array<i32>} : memref<104x8x32xf32, #tpu.memory_space<vmem>>, vector<1x8x32xf32>,
      scf.yield %327 : vector<8x32xf32>
    }
    %c13_i32_12 = arith.constant 13 : i32
    %cst_13 = arith.constant 0.000000e+00 : f32
    %12 = vector.broadcast %cst_13 : f32 to vector<8x4xf32>
    %c0_i32_14 = arith.constant 0 : i32
    %c13_i32_15 = arith.constant 13 : i32
    %13 = arith.addi %c0_i32_14, %c13_i32_15 : i32
    %c1_i32_16 = arith.constant 1 : i32
    %14 = scf.for %arg11 = %c0_i32_14 to %13 step %c1_i32_16 iter_args(%arg12 = %12) -> (vector<8x4xf32>)  : i32 {
      %c8_i32 = arith.constant 8 : i32
      %20 = arith.muli %arg11, %c8_i32 : i32
      %c0_i32_22 = arith.constant 0 : i32
      %21 = arith.addi %20, %c0_i32_22 : i32
      %22 = arith.index_cast %21 : i32 to index
      %c0_23 = arith.constant 0 : index
      %c0_24 = arith.constant 0 : index
      %23 = vector.load %arg10[%22, %c0_23, %c0_24] : memref<104x8x32xf32, #tpu.memory_space<vmem>>, vector<1x8x32xf32>
      %24 = vector.shape_cast %23 : vector<1x8x32xf32> to vector<8x32xf32>
      %25 = arith.index_cast %21 : i32 to index
      %c0_25 = arith.constant 0 : index
      %c0_26 = arith.constant 0 : index
      %26 = vector.load %arg6[%25, %c0_25, %c0_26] : memref<104x32x4xf32, #tpu.memory_space<vmem>>, vector<1x32x4xf32>
      %27 = vector.shape_cast %26 : vector<1x32x4xf32> to vector<32x4xf32>
      %cst_27 = arith.constant dense<0.000000e+00> : vector<8x4xf32>
      %28 = tpu.matmul %24, %27, %cst_27 {dimension_numbers = #tpu.dot_dimension_numbers<[1], [0], [0], [1], [0, 0, 1, 1], [], []>} : vector<8x32xf32>, vector<32x4xf32>, vector<8x4xf32> -> vector<8x4xf32>
      %29 = arith.addf %arg12, %28 : vector<8x4xf32>
      %c8_i32_28 = arith.constant 8 : i32
      %30 = arith.muli %arg11, %c8_i32_28 : i32
      %c1_i32_29 = arith.constant 1 : i32
      %31 = arith.addi %30, %c1_i32_29 : i32
      %32 = arith.index_cast %31 : i32 to index
      %c0_30 = arith.constant 0 : index
      %c0_31 = arith.constant 0 : index
      %33 = vector.load %arg10[%32, %c0_30, %c0_31] : memref<104x8x32xf32, #tpu.memory_space<vmem>>, vector<1x8x32xf32>
      %34 = vector.shape_cast %33 : vector<1x8x32xf32> to vector<8x32xf32>
      %35 = arith.index_cast %31 : i32 to index
      %c0_32 = arith.constant 0 : index
      %c0_33 = arith.constant 0 : index
      %36 = vector.load %arg6[%35, %c0_32, %c0_33] : memref<104x32x4xf32, #tpu.memory_space<vmem>>, vector<1x32x4xf32>
      %37 = vector.shape_cast %36 : vector<1x32x4xf32> to vector<32x4xf32>
      %cst_34 = arith.constant dense<0.000000e+00> : vector<8x4xf32>
      %38 = tpu.matmul %34, %37, %cst_34 {dimension_numbers = #tpu.dot_dimension_numbers<[1], [0], [0], [1], [0, 0, 1, 1], [], []>} : vector<8x32xf32>, vector<32x4xf32>, vector<8x4xf32> -> vector<8x4xf32>
      %39 = arith.addf %29, %38 : vector<8x4xf32>
      %c8_i32_35 = arith.constant 8 : i32
      %40 = arith.muli %arg11, %c8_i32_35 : i32
      %c2_i32 = arith.constant 2 : i32
      %41 = arith.addi %40, %c2_i32 : i32
      %42 = arith.index_cast %41 : i32 to index
      %c0_36 = arith.constant 0 : index
      %c0_37 = arith.constant 0 : index
      %43 = vector.load %arg10[%42, %c0_36, %c0_37] : memref<104x8x32xf32, #tpu.memory_space<vmem>>, vector<1x8x32xf32>
      %44 = vector.shape_cast %43 : vector<1x8x32xf32> to vector<8x32xf32>
      %45 = arith.index_cast %41 : i32 to index
      %c0_38 = arith.constant 0 : index
      %c0_39 = arith.constant 0 : index
      %46 = vector.load %arg6[%45, %c0_38, %c0_39] : memref<104x32x4xf32, #tpu.memory_space<vmem>>, vector<1x32x4xf32>
      %47 = vector.shape_cast %46 : vector<1x32x4xf32> to vector<32x4xf32>
      %cst_40 = arith.constant dense<0.000000e+00> : vector<8x4xf32>
      %48 = tpu.matmul %44, %47, %cst_40 {dimension_numbers = #tpu.dot_dimension_numbers<[1], [0], [0], [1], [0, 0, 1, 1], [], []>} : vector<8x32xf32>, vector<32x4xf32>, vector<8x4xf32> -> vector<8x4xf32>
      %49 = arith.addf %39, %48 : vector<8x4xf32>
      %c8_i32_41 = arith.constant 8 : i32
      %50 = arith.muli %arg11, %c8_i32_41 : i32
      %c3_i32 = arith.constant 3 : i32
      %51 = arith.addi %50, %c3_i32 : i32
      %52 = arith.index_cast %51 : i32 to index
      %c0_42 = arith.constant 0 : index
      %c0_43 = arith.constant 0 : index
      %53 = vector.load %arg10[%52, %c0_42, %c0_43] : memref<104x8x32xf32, #tpu.memory_space<vmem>>, vector<1x8x32xf32>
      %54 = vector.shape_cast %53 : vector<1x8x32xf32> to vector<8x32xf32>
      %55 = arith.index_cast %51 : i32 to index
      %c0_44 = arith.constant 0 : index
      %c0_45 = arith.constant 0 : index
      %56 = vector.load %arg6[%55, %c0_44, %c0_45] : memref<104x32x4xf32, #tpu.memory_space<vmem>>, vector<1x32x4xf32>
      %57 = vector.shape_cast %56 : vector<1x32x4xf32> to vector<32x4xf32>
      %cst_46 = arith.constant dense<0.000000e+00> : vector<8x4xf32>
      %58 = tpu.matmul %54, %57, %cst_46 {dimension_numbers = #tpu.dot_dimension_numbers<[1], [0], [0], [1], [0, 0, 1, 1], [], []>} : vector<8x32xf32>, vector<32x4xf32>, vector<8x4xf32> -> vector<8x4xf32>
      %59 = arith.addf %49, %58 : vector<8x4xf32>
      %c8_i32_47 = arith.constant 8 : i32
      %60 = arith.muli %arg11, %c8_i32_47 : i32
      %c4_i32 = arith.constant 4 : i32
      %61 = arith.addi %60, %c4_i32 : i32
      %62 = arith.index_cast %61 : i32 to index
      %c0_48 = arith.constant 0 : index
      %c0_49 = arith.constant 0 : index
      %63 = vector.load %arg10[%62, %c0_48, %c0_49] : memref<104x8x32xf32, #tpu.memory_space<vmem>>, vector<1x8x32xf32>
      %64 = vector.shape_cast %63 : vector<1x8x32xf32> to vector<8x32xf32>
      %65 = arith.index_cast %61 : i32 to index
      %c0_50 = arith.constant 0 : index
      %c0_51 = arith.constant 0 : index
      %66 = vector.load %arg6[%65, %c0_50, %c0_51] : memref<104x32x4xf32, #tpu.memory_space<vmem>>, vector<1x32x4xf32>
      %67 = vector.shape_cast %66 : vector<1x32x4xf32> to vector<32x4xf32>
      %cst_52 = arith.constant dense<0.000000e+00> : vector<8x4xf32>
      %68 = tpu.matmul %64, %67, %cst_52 {dimension_numbers = #tpu.dot_dimension_numbers<[1], [0], [0], [1], [0, 0, 1, 1], [], []>} : vector<8x32xf32>, vector<32x4xf32>, vector<8x4xf32> -> vector<8x4xf32>
      %69 = arith.addf %59, %68 : vector<8x4xf32>
      %c8_i32_53 = arith.constant 8 : i32
      %70 = arith.muli %arg11, %c8_i32_53 : i32
      %c5_i32 = arith.constant 5 : i32
      %71 = arith.addi %70, %c5_i32 : i32
      %72 = arith.index_cast %71 : i32 to index
      %c0_54 = arith.constant 0 : index
      %c0_55 = arith.constant 0 : index
      %73 = vector.load %arg10[%72, %c0_54, %c0_55] : memref<104x8x32xf32, #tpu.memory_space<vmem>>, vector<1x8x32xf32>
      %74 = vector.shape_cast %73 : vector<1x8x32xf32> to vector<8x32xf32>
      %75 = arith.index_cast %71 : i32 to index
      %c0_56 = arith.constant 0 : index
      %c0_57 = arith.constant 0 : index
      %76 = vector.load %arg6[%75, %c0_56, %c0_57] : memref<104x32x4xf32, #tpu.memory_space<vmem>>, vector<1x32x4xf32>
      %77 = vector.shape_cast %76 : vector<1x32x4xf32> to vector<32x4xf32>
      %cst_58 = arith.constant dense<0.000000e+00> : vector<8x4xf32>
      %78 = tpu.matmul %74, %77, %cst_58 {dimension_numbers = #tpu.dot_dimension_numbers<[1], [0], [0], [1], [0, 0, 1, 1], [], []>} : vector<8x32xf32>, vector<32x4xf32>, vector<8x4xf32> -> vector<8x4xf32>
      %79 = arith.addf %69, %78 : vector<8x4xf32>
      %c8_i32_59 = arith.constant 8 : i32
      %80 = arith.muli %arg11, %c8_i32_59 : i32
      %c6_i32 = arith.constant 6 : i32
      %81 = arith.addi %80, %c6_i32 : i32
      %82 = arith.index_cast %81 : i32 to index
      %c0_60 = arith.constant 0 : index
      %c0_61 = arith.constant 0 : index
      %83 = vector.load %arg10[%82, %c0_60, %c0_61] : memref<104x8x32xf32, #tpu.memory_space<vmem>>, vector<1x8x32xf32>
      %84 = vector.shape_cast %83 : vector<1x8x32xf32> to vector<8x32xf32>
      %85 = arith.index_cast %81 : i32 to index
      %c0_62 = arith.constant 0 : index
      %c0_63 = arith.constant 0 : index
      %86 = vector.load %arg6[%85, %c0_62, %c0_63] : memref<104x32x4xf32, #tpu.memory_space<vmem>>, vector<1x32x4xf32>
      %87 = vector.shape_cast %86 : vector<1x32x4xf32> to vector<32x4xf32>
      %cst_64 = arith.constant dense<0.000000e+00> : vector<8x4xf32>
      %88 = tpu.matmul %84, %87, %cst_64 {dimension_numbers = #tpu.dot_dimension_numbers<[1], [0], [0], [1], [0, 0, 1, 1], [], []>} : vector<8x32xf32>, vector<32x4xf32>, vector<8x4xf32> -> vector<8x4xf32>
      %89 = arith.addf %79, %88 : vector<8x4xf32>
      %c8_i32_65 = arith.constant 8 : i32
      %90 = arith.muli %arg11, %c8_i32_65 : i32
      %c7_i32 = arith.constant 7 : i32
      %91 = arith.addi %90, %c7_i32 : i32
      %92 = arith.index_cast %91 : i32 to index
      %c0_66 = arith.constant 0 : index
      %c0_67 = arith.constant 0 : index
      %93 = vector.load %arg10[%92, %c0_66, %c0_67] : memref<104x8x32xf32, #tpu.memory_space<vmem>>, vector<1x8x32xf32>
      %94 = vector.shape_cast %93 : vector<1x8x32xf32> to vector<8x32xf32>
      %95 = arith.index_cast %91 : i32 to index
      %c0_68 = arith.constant 0 : index
      %c0_69 = arith.constant 0 : index
      %96 = vector.load %arg6[%95, %c0_68, %c0_69] : memref<104x32x4xf32, #tpu.memory_space<vmem>>, vector<1x32x4xf32>
      %97 = vector.shape_cast %96 : vector<1x32x4xf32> to vector<32x4xf32>
      %cst_70 = arith.constant dense<0.000000e+00> : vector<8x4xf32>
      %98 = tpu.matmul %94, %97, %cst_70 {dimension_numbers = #tpu.dot_dimension_numbers<[1], [0], [0], [1], [0, 0, 1, 1], [], []>} : vector<8x32xf32>, vector<32x4xf32>, vector<8x4xf32> -> vector<8x4xf32>
      %99 = arith.addf %89, %98 : vector<8x4xf32>
      scf.yield %99 : vector<8x4xf32>
    }
    %c13_i32_17 = arith.constant 13 : i32
    %c0_18 = arith.constant 0 : index
    %c0_19 = arith.constant 0 : index
    %15 = vector.load %arg7[%c0_18, %c0_19] : memref<1x4xf32, #tpu.memory_space<vmem>>, vector<1x4xf32>
    %16 = vector.broadcast %15 : vector<1x4xf32> to vector<8x4xf32>
    %17 = arith.addf %14, %16 : vector<8x4xf32>
    %18 = vector.extract_strided_slice %17 {offsets = [0, 0], sizes = [2, 4], strides = [1, 1]} : vector<8x4xf32> to vector<2x4xf32>
    %c0_20 = arith.constant 0 : index
    %c0_21 = arith.constant 0 : index
    %19 = vector.load %arg8[%c0_20, %c0_21] : memref<2x4xf32, #tpu.memory_space<vmem>>, vector<2x4xf32>
    tpu.vector_store %arg8[%c0_20, %c0_21], %18 {strides = array<i32>} : memref<2x4xf32, #tpu.memory_space<vmem>>, vector<2x4xf32>,
    return
  }
  func.func @transform_0(%arg0: i32) -> (i32, i32) {
    %c0_i32 = arith.constant 0 : i32
    %c0_i32_0 = arith.constant 0 : i32
    %c0_i32_1 = arith.constant 0 : i32
    return %c0_i32, %c0_i32_0 : i32, i32
  }
  func.func @transform_1(%arg0: i32) -> (i32, i32) {
    %c0_i32 = arith.constant 0 : i32
    %c0_i32_0 = arith.constant 0 : i32
    %c0_i32_1 = arith.constant 0 : i32
    return %c0_i32, %c0_i32_0 : i32, i32
  }
  func.func @transform_2(%arg0: i32) -> (i32, i32) {
    %c0_i32 = arith.constant 0 : i32
    %c0_i32_0 = arith.constant 0 : i32
    %c0_i32_1 = arith.constant 0 : i32
    return %c0_i32, %c0_i32_0 : i32, i32
  }
  func.func @transform_3(%arg0: i32) -> (i32, i32) {
    %c0_i32 = arith.constant 0 : i32
    %c0_i32_0 = arith.constant 0 : i32
    %c0_i32_1 = arith.constant 0 : i32
    return %c0_i32, %c0_i32_0 : i32, i32
  }
  func.func @transform_4(%arg0: i32) -> (i32, i32) {
    %c0_i32 = arith.constant 0 : i32
    %c0_i32_0 = arith.constant 0 : i32
    %c0_i32_1 = arith.constant 0 : i32
    return %c0_i32, %c0_i32_0 : i32, i32
  }
  func.func @transform_5(%arg0: i32) -> (i32, i32, i32) {
    %c0_i32 = arith.constant 0 : i32
    %c0_i32_0 = arith.constant 0 : i32
    %c0_i32_1 = arith.constant 0 : i32
    %c0_i32_2 = arith.constant 0 : i32
    return %c0_i32, %c0_i32_0, %c0_i32_1 : i32, i32, i32
  }
  func.func @transform_6(%arg0: i32) -> (i32, i32) {
    %c0_i32 = arith.constant 0 : i32
    %c0_i32_0 = arith.constant 0 : i32
    %c0_i32_1 = arith.constant 0 : i32
    return %c0_i32, %c0_i32_0 : i32, i32
  }
  func.func @transform_7(%arg0: i32) -> (i32, i32) {
    %c0_i32 = arith.constant 0 : i32
    %c0_i32_0 = arith.constant 0 : i32
    %c0_i32_1 = arith.constant 0 : i32
    return %c0_i32, %c0_i32_0 : i32, i32
  }
}

</mosaic_0001>

<bundles_post_ra>
// kernel: tpu_custom_call.1
= control target key start
LH: loop header
LB: loop body
LE: loop exit
PB: predicated region body
PF: predicated region fallthrough
CT: control target
= control target key end

     0   :  { %12 = vsyncpa [#allocation5], 0  ;;  %vm139_vm0 = vcmask 64512   ;;  %s4786_s0 = inlined_call_operand.vmem [shape: f32[832,8], index: 0, kind: input, shape index: {}]   ;;  %s4787_s1 = inlined_call_operand.vmem [shape: f32[8,128], index: 1, kind: input, shape index: {}]   ;;  %s4788_s2 = inlined_call_operand.vmem [shape: f32[1,128], index: 2, kind: input, shape index: {}]   ;;  %s4789_s3 = inlined_call_operand.vmem [shape: f32[32,128], index: 3, kind: input, shape index: {}]   ;;  %s4790_s4 = inlined_call_operand.vmem [shape: f32[1,128], index: 4, kind: input, shape index: {}]   ;;  %s4791_s5 = inlined_call_operand.vmem [shape: f32[104,32,4], index: 5, kind: input, shape index: {}]   ;;  %s4792_s6 = inlined_call_operand.vmem [shape: f32[1,4], index: 6, kind: input, shape index: {}]   ;;  %s4793_s7 = inlined_call_operand.hbm [shape: f32[2,4], index: 7, kind: output, shape index: {}]  }
   0x1   :  { %v131_v0 = vld [vmem:[%s4787_s1] sm:$0xff]  ;;  %v28_v3 = vld [vmem:[%s4786_s0 + $0x8] sm:$0xff]  ;;  %v29_v5 = vld [vmem:[%s4786_s0 + $0x10] sm:$0xff] }
   0x2   :  { %v27_v1 = vld [vmem:[%s4786_s0] sm:$0xff]  ;;  %3326 = vmatprep.subr.mxu0 %v131_v0  ;;  %3756 = vmatprep.subr.mxu1 %v131_v0  ;;  %v80_v4 = vld [vmem:[%s4786_s0 + $0x1a8] sm:$0xff]  ;;  %v81_v6 = vld [vmem:[%s4786_s0 + $0x1b0] sm:$0xff] }
   0x3   :  { %v79_v2 = vld [vmem:[%s4786_s0 + $0x1a0] sm:$0xff]  ;;  %3327 = vmatpush3.msra.mxu0 %v131_v0  ;;  %3757 = vmatpush3.msra.mxu1 %v131_v0  ;;  %v30_v7 = vld [vmem:[%s4786_s0 + $0x18] sm:$0xff]  ;;  %v32_v11 = vld [vmem:[%s4786_s0 + $0x28] sm:$0xff] }
   0x4   :  { %3328 = vmatprep.mubr.msk.f32.mxu0 %vm139_vm0, %v27_v1  ;;  %3406 = vmatprep.mubr.msk.f32.mxu1 %vm139_vm0, %v79_v2  ;;  %v82_v8 = vld [vmem:[%s4786_s0 + $0x1b8] sm:$0xff]  ;;  %v31_v9 = vld [vmem:[%s4786_s0 + $0x20] sm:$0xff]  ;;  %v84_v12 = vld [vmem:[%s4786_s0 + $0x1c8] sm:$0xff] }
   0x5   :  { %3329 = vmatmul.mubr.msk.f32.vlgmr.msra.gmra.mrb[0].mxu0 %vm139_vm0, %v28_v3  ;;  %3407 = vmatmul.mubr.msk.f32.vlgmr.msra.gmra.mrb[0].mxu1 %vm139_vm0, %v80_v4  ;;  %v83_v10 = vld [vmem:[%s4786_s0 + $0x1c0] sm:$0xff]  ;;  %v33_v13 = vld [vmem:[%s4786_s0 + $0x30] sm:$0xff]  ;;  %v34_v15 = vld [vmem:[%s4786_s0 + $0x38] sm:$0xff] }
   0x6   :  { %3331 = vmatprep.mubr.msk.f32.mxu0 %vm139_vm0, %v29_v5  ;;  %3409 = vmatprep.mubr.msk.f32.mxu1 %vm139_vm0, %v81_v6  ;;  %v85_v14 = vld [vmem:[%s4786_s0 + $0x1d0] sm:$0xff]  ;;  %v86_v16 = vld [vmem:[%s4786_s0 + $0x1d8] sm:$0xff]  ;;  %v35_v17 = vld [vmem:[%s4786_s0 + $0x40] sm:$0xff] }
   0x7   :  { %v87_v18 = vld [vmem:[%s4786_s0 + $0x1e0] sm:$0xff]  ;;  %v36_v19 = vld [vmem:[%s4786_s0 + $0x48] sm:$0xff]  ;;  %v37_v21 = vld [vmem:[%s4786_s0 + $0x50] sm:$0xff] }
   0x8   :  { %v88_v20 = vld [vmem:[%s4786_s0 + $0x1e8] sm:$0xff]  ;;  %v89_v22 = vld [vmem:[%s4786_s0 + $0x1f0] sm:$0xff]  ;;  %v38_v23 = vld [vmem:[%s4786_s0 + $0x58] sm:$0xff] }
   0x9   :  { %3332 = vmatmul.mubr.msk.f32.gmra.mrb[2].mxu0 %vm139_vm0, %v30_v7  ;;  %3410 = vmatmul.mubr.msk.f32.gmra.mrb[2].mxu1 %vm139_vm0, %v82_v8  ;;  %v90_v24 = vld [vmem:[%s4786_s0 + $0x1f8] sm:$0xff]  ;;  %v39_v25 = vld [vmem:[%s4786_s0 + $0x60] sm:$0xff]  ;;  %v40_v27 = vld [vmem:[%s4786_s0 + $0x68] sm:$0xff] }
   0xa   :  { %3334 = vmatprep.mubr.msk.f32.mxu0 %vm139_vm0, %v31_v9  ;;  %3412 = vmatprep.mubr.msk.f32.mxu1 %vm139_vm0, %v83_v10  ;;  %v91_v26 = vld [vmem:[%s4786_s0 + $0x200] sm:$0xff]  ;;  %v92_v28 = vld [vmem:[%s4786_s0 + $0x208] sm:$0xff]  ;;  %v41_v29 = vld [vmem:[%s4786_s0 + $0x70] sm:$0xff] }
   0xb   :  { %v93_v30 = vld [vmem:[%s4786_s0 + $0x210] sm:$0xff]  ;;  %v42_v31 = vld [vmem:[%s4786_s0 + $0x78] sm:$0xff]  ;;  %v43_v33 = vld [vmem:[%s4786_s0 + $0x80] sm:$0xff] }
   0xc   :  { %v94_v32 = vld [vmem:[%s4786_s0 + $0x218] sm:$0xff]  ;;  %v95_v34 = vld [vmem:[%s4786_s0 + $0x220] sm:$0xff]  ;;  %v44_v35 = vld [vmem:[%s4786_s0 + $0x88] sm:$0xff] }
   0xd   :  { %3335 = vmatmul.mubr.msk.f32.gmra.mrb[4].mxu0 %vm139_vm0, %v32_v11  ;;  %3413 = vmatmul.mubr.msk.f32.gmra.mrb[4].mxu1 %vm139_vm0, %v84_v12  ;;  %v96_v36 = vld [vmem:[%s4786_s0 + $0x228] sm:$0xff]  ;;  %v45_v37 = vld [vmem:[%s4786_s0 + $0x90] sm:$0xff]  ;;  %v46_v39 = vld [vmem:[%s4786_s0 + $0x98] sm:$0xff] }
   0xe   :  { %3337 = vmatprep.mubr.msk.f32.mxu0 %vm139_vm0, %v33_v13  ;;  %3415 = vmatprep.mubr.msk.f32.mxu1 %vm139_vm0, %v85_v14  ;;  %v97_v38 = vld [vmem:[%s4786_s0 + $0x230] sm:$0xff]  ;;  %v98_v40 = vld [vmem:[%s4786_s0 + $0x238] sm:$0xff]  ;;  %v47_v41 = vld [vmem:[%s4786_s0 + $0xa0] sm:$0xff] }
   0xf   :  { %v99_v42 = vld [vmem:[%s4786_s0 + $0x240] sm:$0xff]  ;;  %v48_v43 = vld [vmem:[%s4786_s0 + $0xa8] sm:$0xff]  ;;  %v49_v45 = vld [vmem:[%s4786_s0 + $0xb0] sm:$0xff] }
  0x10   :  { %v100_v44 = vld [vmem:[%s4786_s0 + $0x248] sm:$0xff]  ;;  %v101_v46 = vld [vmem:[%s4786_s0 + $0x250] sm:$0xff]  ;;  %v50_v47 = vld [vmem:[%s4786_s0 + $0xb8] sm:$0xff] }
  0x11   :  { %3338 = vmatmul.mubr.msk.f32.gmra.mrb[6].mxu0 %vm139_vm0, %v34_v15  ;;  %3416 = vmatmul.mubr.msk.f32.gmra.mrb[6].mxu1 %vm139_vm0, %v86_v16  ;;  %v102_v48 = vld [vmem:[%s4786_s0 + $0x258] sm:$0xff]  ;;  %v51_v49 = vld [vmem:[%s4786_s0 + $0xc0] sm:$0xff]  ;;  %v52_v51 = vld [vmem:[%s4786_s0 + $0xc8] sm:$0xff] }
  0x12   :  { %3340 = vmatprep.mubr.msk.f32.mxu0 %vm139_vm0, %v35_v17  ;;  %3418 = vmatprep.mubr.msk.f32.mxu1 %vm139_vm0, %v87_v18  ;;  %v103_v50 = vld [vmem:[%s4786_s0 + $0x260] sm:$0xff]  ;;  %v104_v52 = vld [vmem:[%s4786_s0 + $0x268] sm:$0xff]  ;;  %v53_v53 = vld [vmem:[%s4786_s0 + $0xd0] sm:$0xff] }
  0x13   :  { %v105_v54 = vld [vmem:[%s4786_s0 + $0x270] sm:$0xff]  ;;  %v54_v55 = vld [vmem:[%s4786_s0 + $0xd8] sm:$0xff]  ;;  %v55_v57 = vld [vmem:[%s4786_s0 + $0xe0] sm:$0xff] }
  0x14   :  { %v106_v56 = vld [vmem:[%s4786_s0 + $0x278] sm:$0xff]  ;;  %v107_v58 = vld [vmem:[%s4786_s0 + $0x280] sm:$0xff]  ;;  %v56_v59 = vld [vmem:[%s4786_s0 + $0xe8] sm:$0xff] }
  0x15   :  { %3341 = vmatmul.mubr.msk.f32.gmra.mrb[8].mxu0 %vm139_vm0, %v36_v19  ;;  %3419 = vmatmul.mubr.msk.f32.gmra.mrb[8].mxu1 %vm139_vm0, %v88_v20  ;;  %v108_v60 = vld [vmem:[%s4786_s0 + $0x288] sm:$0xff]  ;;  %v57_v61 = vld [vmem:[%s4786_s0 + $0xf0] sm:$0xff]  ;;  %v58_v63 = vld [vmem:[%s4786_s0 + $0xf8] sm:$0xff] }
  0x16   :  { %3343 = vmatprep.mubr.msk.f32.mxu0 %vm139_vm0, %v37_v21  ;;  %3421 = vmatprep.mubr.msk.f32.mxu1 %vm139_vm0, %v89_v22  ;;  %v109_v62 = vld [vmem:[%s4786_s0 + $0x290] sm:$0xff]  ;;  %v110_v0 = vld [vmem:[%s4786_s0 + $0x298] sm:$0xff]  ;;  %v59_v1 = vld [vmem:[%s4786_s0 + $0x100] sm:$0xff] }
  0x17   :  { %v111_v2 = vld [vmem:[%s4786_s0 + $0x2a0] sm:$0xff]  ;;  %v60_v3 = vld [vmem:[%s4786_s0 + $0x108] sm:$0xff]  ;;  %v61_v5 = vld [vmem:[%s4786_s0 + $0x110] sm:$0xff] }
  0x18   :  { %v112_v4 = vld [vmem:[%s4786_s0 + $0x2a8] sm:$0xff]  ;;  %v113_v6 = vld [vmem:[%s4786_s0 + $0x2b0] sm:$0xff]  ;;  %v62_v7 = vld [vmem:[%s4786_s0 + $0x118] sm:$0xff] }
  0x19   :  { %3344 = vmatmul.mubr.msk.f32.gmra.mrb[10].mxu0 %vm139_vm0, %v38_v23  ;;  %3422 = vmatmul.mubr.msk.f32.gmra.mrb[10].mxu1 %vm139_vm0, %v90_v24  ;;  %v114_v8 = vld [vmem:[%s4786_s0 + $0x2b8] sm:$0xff]  ;;  %v63_v9 = vld [vmem:[%s4786_s0 + $0x120] sm:$0xff]  ;;  %v64_v11 = vld [vmem:[%s4786_s0 + $0x128] sm:$0xff] }
  0x1a   :  { %3346 = vmatprep.mubr.msk.f32.mxu0 %vm139_vm0, %v39_v25  ;;  %3424 = vmatprep.mubr.msk.f32.mxu1 %vm139_vm0, %v91_v26  ;;  %v115_v10 = vld [vmem:[%s4786_s0 + $0x2c0] sm:$0xff]  ;;  %v116_v12 = vld [vmem:[%s4786_s0 + $0x2c8] sm:$0xff]  ;;  %v65_v13 = vld [vmem:[%s4786_s0 + $0x130] sm:$0xff] }
  0x1b   :  { %v117_v14 = vld [vmem:[%s4786_s0 + $0x2d0] sm:$0xff]  ;;  %v66_v15 = vld [vmem:[%s4786_s0 + $0x138] sm:$0xff]  ;;  %v67_v17 = vld [vmem:[%s4786_s0 + $0x140] sm:$0xff] }
  0x1c   :  { %v118_v16 = vld [vmem:[%s4786_s0 + $0x2d8] sm:$0xff]  ;;  %v119_v18 = vld [vmem:[%s4786_s0 + $0x2e0] sm:$0xff]  ;;  %v68_v19 = vld [vmem:[%s4786_s0 + $0x148] sm:$0xff] }
  0x1d   :  { %3347 = vmatmul.mubr.msk.f32.gmra.mrb[12].mxu0 %vm139_vm0, %v40_v27  ;;  %3425 = vmatmul.mubr.msk.f32.gmra.mrb[12].mxu1 %vm139_vm0, %v92_v28  ;;  %v120_v20 = vld [vmem:[%s4786_s0 + $0x2e8] sm:$0xff]  ;;  %v69_v21 = vld [vmem:[%s4786_s0 + $0x150] sm:$0xff]  ;;  %v70_v23 = vld [vmem:[%s4786_s0 + $0x158] sm:$0xff] }
  0x1e   :  { %3349 = vmatprep.mubr.msk.f32.mxu0 %vm139_vm0, %v41_v29  ;;  %3427 = vmatprep.mubr.msk.f32.mxu1 %vm139_vm0, %v93_v30  ;;  %v121_v22 = vld [vmem:[%s4786_s0 + $0x2f0] sm:$0xff]  ;;  %v122_v24 = vld [vmem:[%s4786_s0 + $0x2f8] sm:$0xff]  ;;  %v71_v25 = vld [vmem:[%s4786_s0 + $0x160] sm:$0xff] }
  0x1f   :  { %v123_v26 = vld [vmem:[%s4786_s0 + $0x300] sm:$0xff]  ;;  %v72_v27 = vld [vmem:[%s4786_s0 + $0x168] sm:$0xff]  ;;  %v73_v29 = vld [vmem:[%s4786_s0 + $0x170] sm:$0xff] }
  0x20   :  { %v124_v28 = vld [vmem:[%s4786_s0 + $0x308] sm:$0xff]  ;;  %v125_v30 = vld [vmem:[%s4786_s0 + $0x310] sm:$0xff] }
  0x21   :  { %3350 = vmatmul.mubr.msk.f32.gmra.mrb[14].mxu0 %vm139_vm0, %v42_v31  ;;  %3428 = vmatmul.mubr.msk.f32.gmra.mrb[14].mxu1 %vm139_vm0, %v94_v32  ;;  %v74_v31 = vld [vmem:[%s4786_s0 + $0x178] sm:$0xff] }
  0x22   :  { %3352 = vmatprep.mubr.msk.f32.mxu0 %vm139_vm0, %v43_v33  ;;  %3430 = vmatprep.mubr.msk.f32.mxu1 %vm139_vm0, %v95_v34  ;;  %v126_v32 = vld [vmem:[%s4786_s0 + $0x318] sm:$0xff]  ;;  %v75_v33 = vld [vmem:[%s4786_s0 + $0x180] sm:$0xff] }
  0x23   :  { %v127_v34 = vld [vmem:[%s4786_s0 + $0x320] sm:$0xff] }
  0x25   :  { %3353 = vmatmul.mubr.msk.f32.gmra.mrb[16].mxu0 %vm139_vm0, %v44_v35  ;;  %3431 = vmatmul.mubr.msk.f32.gmra.mrb[16].mxu1 %vm139_vm0, %v96_v36  ;;  %v76_v35 = vld [vmem:[%s4786_s0 + $0x188] sm:$0xff] }
  0x26   :  { %3355 = vmatprep.mubr.msk.f32.mxu0 %vm139_vm0, %v45_v37  ;;  %3433 = vmatprep.mubr.msk.f32.mxu1 %vm139_vm0, %v97_v38  ;;  %v128_v36 = vld [vmem:[%s4786_s0 + $0x328] sm:$0xff]  ;;  %v77_v37 = vld [vmem:[%s4786_s0 + $0x190] sm:$0xff] }
  0x27   :  { %v129_v38 = vld [vmem:[%s4786_s0 + $0x330] sm:$0xff] }
  0x29   :  { %3356 = vmatmul.mubr.msk.f32.gmra.mrb[18].mxu0 %vm139_vm0, %v46_v39  ;;  %3434 = vmatmul.mubr.msk.f32.gmra.mrb[18].mxu1 %vm139_vm0, %v98_v40  ;;  %v78_v39 = vld [vmem:[%s4786_s0 + $0x198] sm:$0xff] }
  0x2a   :  { %3358 = vmatprep.mubr.msk.f32.mxu0 %vm139_vm0, %v47_v41  ;;  %3436 = vmatprep.mubr.msk.f32.mxu1 %vm139_vm0, %v99_v42  ;;  %v130_v40 = vld [vmem:[%s4786_s0 + $0x338] sm:$0xff]  ;;  %v4388_v41 = vld [vmem:[%s4789_s3] sm:$0xff]  ;;  %v4393_v42 = vld [vmem:[%s4789_s3 + $0x8] sm:$0xff] }
  0x2d   :  { %3359 = vmatmul.mubr.msk.f32.gmra.mrb[20].mxu0 %vm139_vm0, %v48_v43  ;;  %3437 = vmatmul.mubr.msk.f32.gmra.mrb[20].mxu1 %vm139_vm0, %v100_v44  ;;  %v4398_v43 = vld [vmem:[%s4789_s3 + $0x10] sm:$0xff]  ;;  %v4403_v44 = vld [vmem:[%s4789_s3 + $0x18] sm:$0xff] }
  0x2e   :  { %3361 = vmatprep.mubr.msk.f32.mxu0 %vm139_vm0, %v49_v45  ;;  %3439 = vmatprep.mubr.msk.f32.mxu1 %vm139_vm0, %v101_v46  ;;  %v4408_v45 = vld [vmem:[%s4790_s4] ss:$0 sm:$0xff] }
  0x2f   :  { %v4413_v46 = vld [vmem:[%s4788_s2] ss:$0 sm:$0xff]  ;;  %s4521_s2 = smov 0  }
  0x31   :  { %3362 = vmatmul.mubr.msk.f32.gmra.mrb[22].mxu0 %vm139_vm0, %v50_v47  ;;  %3440 = vmatmul.mubr.msk.f32.gmra.mrb[22].mxu1 %vm139_vm0, %v102_v48 }
  0x32   :  { %3364 = vmatprep.mubr.msk.f32.mxu0 %vm139_vm0, %v51_v49  ;;  %3442 = vmatprep.mubr.msk.f32.mxu1 %vm139_vm0, %v103_v50 }
  0x35   :  { %3365 = vmatmul.mubr.msk.f32.gmra.mrb[24].mxu0 %vm139_vm0, %v52_v51  ;;  %3443 = vmatmul.mubr.msk.f32.gmra.mrb[24].mxu1 %vm139_vm0, %v104_v52 }
  0x36   :  { %3367 = vmatprep.mubr.msk.f32.mxu0 %vm139_vm0, %v53_v53  ;;  %3445 = vmatprep.mubr.msk.f32.mxu1 %vm139_vm0, %v105_v54 }
  0x39   :  { %3368 = vmatmul.mubr.msk.f32.gmra.mrb[26].mxu0 %vm139_vm0, %v54_v55  ;;  %3446 = vmatmul.mubr.msk.f32.gmra.mrb[26].mxu1 %vm139_vm0, %v106_v56 }
  0x3a   :  { %3370 = vmatprep.mubr.msk.f32.mxu0 %vm139_vm0, %v55_v57  ;;  %3448 = vmatprep.mubr.msk.f32.mxu1 %vm139_vm0, %v107_v58 }
  0x3d   :  { %3371 = vmatmul.mubr.msk.f32.gmra.mrb[28].mxu0 %vm139_vm0, %v56_v59  ;;  %3449 = vmatmul.mubr.msk.f32.gmra.mrb[28].mxu1 %vm139_vm0, %v108_v60 }
  0x3e   :  { %3373 = vmatprep.mubr.msk.f32.mxu0 %vm139_vm0, %v57_v61  ;;  %3451 = vmatprep.mubr.msk.f32.mxu1 %vm139_vm0, %v109_v62 }
  0x41   :  { %3374 = vmatmul.mubr.msk.f32.gmra.mrb[30].mxu0 %vm139_vm0, %v58_v63  ;;  %3452 = vmatmul.mubr.msk.f32.gmra.mrb[30].mxu1 %vm139_vm0, %v110_v0 }
  0x42   :  { %3376 = vmatprep.mubr.msk.f32.mxu0 %vm139_vm0, %v59_v1  ;;  %3454 = vmatprep.mubr.msk.f32.mxu1 %vm139_vm0, %v111_v2 }
  0x45   :  { %3377 = vmatmul.mubr.msk.f32.gmra.mrb[32].mxu0 %vm139_vm0, %v60_v3  ;;  %3455 = vmatmul.mubr.msk.f32.gmra.mrb[32].mxu1 %vm139_vm0, %v112_v4 }
  0x46   :  { %3379 = vmatprep.mubr.msk.f32.mxu0 %vm139_vm0, %v61_v5  ;;  %3457 = vmatprep.mubr.msk.f32.mxu1 %vm139_vm0, %v113_v6 }
  0x49   :  { %3380 = vmatmul.mubr.msk.f32.gmra.mrb[34].mxu0 %vm139_vm0, %v62_v7  ;;  %3458 = vmatmul.mubr.msk.f32.gmra.mrb[34].mxu1 %vm139_vm0, %v114_v8 }
  0x4a   :  { %3382 = vmatprep.mubr.msk.f32.mxu0 %vm139_vm0, %v63_v9  ;;  %3460 = vmatprep.mubr.msk.f32.mxu1 %vm139_vm0, %v115_v10 }
  0x4d   :  { %3383 = vmatmul.mubr.msk.f32.gmra.mrb[36].mxu0 %vm139_vm0, %v64_v11  ;;  %3461 = vmatmul.mubr.msk.f32.gmra.mrb[36].mxu1 %vm139_vm0, %v116_v12 }
  0x4e   :  { %3385 = vmatprep.mubr.msk.f32.mxu0 %vm139_vm0, %v65_v13  ;;  %3463 = vmatprep.mubr.msk.f32.mxu1 %vm139_vm0, %v117_v14 }
  0x51   :  { %3386 = vmatmul.mubr.msk.f32.gmra.mrb[38].mxu0 %vm139_vm0, %v66_v15  ;;  %3464 = vmatmul.mubr.msk.f32.gmra.mrb[38].mxu1 %vm139_vm0, %v118_v16 }
  0x52   :  { %3388 = vmatprep.mubr.msk.f32.mxu0 %vm139_vm0, %v67_v17  ;;  %3466 = vmatprep.mubr.msk.f32.mxu1 %vm139_vm0, %v119_v18 }
  0x55   :  { %3389 = vmatmul.mubr.msk.f32.gmra.mrb[40].mxu0 %vm139_vm0, %v68_v19  ;;  %3467 = vmatmul.mubr.msk.f32.gmra.mrb[40].mxu1 %vm139_vm0, %v120_v20 }
  0x56   :  { %3391 = vmatprep.mubr.msk.f32.mxu0 %vm139_vm0, %v69_v21  ;;  %3469 = vmatprep.mubr.msk.f32.mxu1 %vm139_vm0, %v121_v22 }
  0x59   :  { %3392 = vmatmul.mubr.msk.f32.gmra.mrb[42].mxu0 %vm139_vm0, %v70_v23  ;;  %3470 = vmatmul.mubr.msk.f32.gmra.mrb[42].mxu1 %vm139_vm0, %v122_v24 }
  0x5a   :  { %3394 = vmatprep.mubr.msk.f32.mxu0 %vm139_vm0, %v71_v25  ;;  %3472 = vmatprep.mubr.msk.f32.mxu1 %vm139_vm0, %v123_v26 }
  0x5d   :  { %3395 = vmatmul.mubr.msk.f32.gmra.mrb[44].mxu0 %vm139_vm0, %v72_v27  ;;  %3473 = vmatmul.mubr.msk.f32.gmra.mrb[44].mxu1 %vm139_vm0, %v124_v28 }
  0x5e   :  { %3397 = vmatprep.mubr.msk.f32.mxu0 %vm139_vm0, %v73_v29  ;;  %3475 = vmatprep.mubr.msk.f32.mxu1 %vm139_vm0, %v125_v30 }
  0x61   :  { %3398 = vmatmul.mubr.msk.f32.gmra.mrb[46].mxu0 %vm139_vm0, %v74_v31  ;;  %3476 = vmatmul.mubr.msk.f32.gmra.mrb[46].mxu1 %vm139_vm0, %v126_v32 }
  0x62   :  { %3400 = vmatprep.mubr.msk.f32.mxu0 %vm139_vm0, %v75_v33  ;;  %3478 = vmatprep.mubr.msk.f32.mxu1 %vm139_vm0, %v127_v34 }
  0x65   :  { %3401 = vmatmul.mubr.msk.f32.gmra.mrb[48].mxu0 %vm139_vm0, %v76_v35  ;;  %3479 = vmatmul.mubr.msk.f32.gmra.mrb[48].mxu1 %vm139_vm0, %v128_v36 }
  0x66   :  { %3403 = vmatprep.mubr.msk.f32.mxu0 %vm139_vm0, %v77_v37  ;;  %3481 = vmatprep.mubr.msk.f32.mxu1 %vm139_vm0, %v129_v38 }
  0x69   :  { %3404 = vmatmul.mubr.msk.f32.gmra.mrb[50].mxu0 %vm139_vm0, %v78_v39  ;;  %3482 = vmatmul.mubr.msk.f32.gmra.mrb[50].mxu1 %vm139_vm0, %v130_v40 }
  0xd8   :  { %v3330_v47 = vpop.f32.mrb[0].mxu0  ;;  %v3408_v48 = vpop.f32.mrb[0].mxu1 }
  0xd9   :  { %v524_v49 = vadd.f32 %v3330_v47, %v4413_v46  ;;  %v784_v50 = vadd.f32 %v3408_v48, %v4413_v46  ;;  %v518_v51 = vpop.f32.mrb[1].mxu0  ;;  %v778_v52 = vpop.f32.mrb[1].mxu1 }
  0xda   :  { %v519_v53 = vadd.f32 %v4413_v46, %v518_v51  ;;  %v779_v54 = vadd.f32 %v4413_v46, %v778_v52 }
  0xdb   :  { %1038 = vst [vmem:[#allocation2 + $0x8] sm:$0xff] %v524_v49  ;;  %1090 = vst [vmem:[#allocation2 + $0x1a8] sm:$0xff] %v784_v50 }
  0xdc   :  { %1037 = vst [vmem:[#allocation2] sm:$0xff] %v519_v53  ;;  %1089 = vst [vmem:[#allocation2 + $0x1a0] sm:$0xff] %v779_v54  ;;  %v3333_v55 = vpop.f32.mrb[2].mxu0  ;;  %v3411_v56 = vpop.f32.mrb[2].mxu1 }
  0xdd   :  { %v534_v57 = vadd.f32 %v3333_v55, %v4413_v46  ;;  %v794_v58 = vadd.f32 %v3411_v56, %v4413_v46  ;;  %v528_v59 = vpop.f32.mrb[3].mxu0  ;;  %v788_v60 = vpop.f32.mrb[3].mxu1 }
  0xde   :  { %v529_v61 = vadd.f32 %v4413_v46, %v528_v59  ;;  %v789_v62 = vadd.f32 %v4413_v46, %v788_v60 }
  0xdf   :  { %1040 = vst [vmem:[#allocation2 + $0x18] sm:$0xff] %v534_v57  ;;  %1092 = vst [vmem:[#allocation2 + $0x1b8] sm:$0xff] %v794_v58 }
  0xe0   :  { %1039 = vst [vmem:[#allocation2 + $0x10] sm:$0xff] %v529_v61  ;;  %1091 = vst [vmem:[#allocation2 + $0x1b0] sm:$0xff] %v789_v62  ;;  %v3336_v63 = vpop.f32.mrb[4].mxu0  ;;  %v3414_v0 = vpop.f32.mrb[4].mxu1 }
  0xe1   :  { %v544_v1 = vadd.f32 %v3336_v63, %v4413_v46  ;;  %v804_v2 = vadd.f32 %v3414_v0, %v4413_v46  ;;  %v538_v3 = vpop.f32.mrb[5].mxu0  ;;  %v798_v4 = vpop.f32.mrb[5].mxu1 }
  0xe2   :  { %v539_v5 = vadd.f32 %v4413_v46, %v538_v3  ;;  %v799_v6 = vadd.f32 %v4413_v46, %v798_v4 }
  0xe3   :  { %1042 = vst [vmem:[#allocation2 + $0x28] sm:$0xff] %v544_v1  ;;  %1094 = vst [vmem:[#allocation2 + $0x1c8] sm:$0xff] %v804_v2 }
  0xe4   :  { %1041 = vst [vmem:[#allocation2 + $0x20] sm:$0xff] %v539_v5  ;;  %1093 = vst [vmem:[#allocation2 + $0x1c0] sm:$0xff] %v799_v6  ;;  %v3339_v7 = vpop.f32.mrb[6].mxu0  ;;  %v3417_v8 = vpop.f32.mrb[6].mxu1 }
  0xe5   :  { %v554_v9 = vadd.f32 %v3339_v7, %v4413_v46  ;;  %v814_v10 = vadd.f32 %v3417_v8, %v4413_v46  ;;  %v548_v11 = vpop.f32.mrb[7].mxu0  ;;  %v808_v12 = vpop.f32.mrb[7].mxu1 }
  0xe6   :  { %v549_v13 = vadd.f32 %v4413_v46, %v548_v11  ;;  %v809_v14 = vadd.f32 %v4413_v46, %v808_v12 }
  0xe7   :  { %1044 = vst [vmem:[#allocation2 + $0x38] sm:$0xff] %v554_v9  ;;  %1096 = vst [vmem:[#allocation2 + $0x1d8] sm:$0xff] %v814_v10 }
  0xe8   :  { %1043 = vst [vmem:[#allocation2 + $0x30] sm:$0xff] %v549_v13  ;;  %1095 = vst [vmem:[#allocation2 + $0x1d0] sm:$0xff] %v809_v14  ;;  %v3342_v15 = vpop.f32.mrb[8].mxu0  ;;  %v3420_v16 = vpop.f32.mrb[8].mxu1 }
  0xe9   :  { %v564_v17 = vadd.f32 %v3342_v15, %v4413_v46  ;;  %v824_v18 = vadd.f32 %v3420_v16, %v4413_v46  ;;  %v558_v19 = vpop.f32.mrb[9].mxu0  ;;  %v818_v20 = vpop.f32.mrb[9].mxu1 }
  0xea   :  { %v559_v21 = vadd.f32 %v4413_v46, %v558_v19  ;;  %v819_v22 = vadd.f32 %v4413_v46, %v818_v20 }
  0xeb   :  { %1046 = vst [vmem:[#allocation2 + $0x48] sm:$0xff] %v564_v17  ;;  %1098 = vst [vmem:[#allocation2 + $0x1e8] sm:$0xff] %v824_v18 }
  0xec   :  { %1045 = vst [vmem:[#allocation2 + $0x40] sm:$0xff] %v559_v21  ;;  %1097 = vst [vmem:[#allocation2 + $0x1e0] sm:$0xff] %v819_v22  ;;  %v3345_v23 = vpop.f32.mrb[10].mxu0  ;;  %v3423_v24 = vpop.f32.mrb[10].mxu1 }
  0xed   :  { %v574_v25 = vadd.f32 %v3345_v23, %v4413_v46  ;;  %v834_v26 = vadd.f32 %v3423_v24, %v4413_v46  ;;  %v568_v27 = vpop.f32.mrb[11].mxu0  ;;  %v828_v28 = vpop.f32.mrb[11].mxu1 }
  0xee   :  { %v569_v29 = vadd.f32 %v4413_v46, %v568_v27  ;;  %v829_v30 = vadd.f32 %v4413_v46, %v828_v28 }
  0xef   :  { %1048 = vst [vmem:[#allocation2 + $0x58] sm:$0xff] %v574_v25  ;;  %1100 = vst [vmem:[#allocation2 + $0x1f8] sm:$0xff] %v834_v26 }
  0xf0   :  { %1047 = vst [vmem:[#allocation2 + $0x50] sm:$0xff] %v569_v29  ;;  %1099 = vst [vmem:[#allocation2 + $0x1f0] sm:$0xff] %v829_v30  ;;  %v3348_v31 = vpop.f32.mrb[12].mxu0  ;;  %v3426_v32 = vpop.f32.mrb[12].mxu1 }
  0xf1   :  { %v584_v33 = vadd.f32 %v3348_v31, %v4413_v46  ;;  %v844_v34 = vadd.f32 %v3426_v32, %v4413_v46  ;;  %v578_v35 = vpop.f32.mrb[13].mxu0  ;;  %v838_v36 = vpop.f32.mrb[13].mxu1 }
  0xf2   :  { %v579_v37 = vadd.f32 %v4413_v46, %v578_v35  ;;  %v839_v38 = vadd.f32 %v4413_v46, %v838_v36 }
  0xf3   :  { %1050 = vst [vmem:[#allocation2 + $0x68] sm:$0xff] %v584_v33  ;;  %1102 = vst [vmem:[#allocation2 + $0x208] sm:$0xff] %v844_v34 }
  0xf4   :  { %1049 = vst [vmem:[#allocation2 + $0x60] sm:$0xff] %v579_v37  ;;  %1101 = vst [vmem:[#allocation2 + $0x200] sm:$0xff] %v839_v38  ;;  %v3351_v39 = vpop.f32.mrb[14].mxu0  ;;  %v3429_v40 = vpop.f32.mrb[14].mxu1 }
  0xf5   :  { %v594_v47 = vadd.f32 %v3351_v39, %v4413_v46  ;;  %v854_v48 = vadd.f32 %v3429_v40, %v4413_v46  ;;  %v588_v49 = vpop.f32.mrb[15].mxu0  ;;  %v848_v50 = vpop.f32.mrb[15].mxu1 }
  0xf6   :  { %v589_v51 = vadd.f32 %v4413_v46, %v588_v49  ;;  %v849_v52 = vadd.f32 %v4413_v46, %v848_v50 }
  0xf7   :  { %1052 = vst [vmem:[#allocation2 + $0x78] sm:$0xff] %v594_v47  ;;  %1104 = vst [vmem:[#allocation2 + $0x218] sm:$0xff] %v854_v48 }
  0xf8   :  { %1051 = vst [vmem:[#allocation2 + $0x70] sm:$0xff] %v589_v51  ;;  %1103 = vst [vmem:[#allocation2 + $0x210] sm:$0xff] %v849_v52  ;;  %v3354_v53 = vpop.f32.mrb[16].mxu0  ;;  %v3432_v54 = vpop.f32.mrb[16].mxu1 }
  0xf9   :  { %v604_v55 = vadd.f32 %v3354_v53, %v4413_v46  ;;  %v864_v56 = vadd.f32 %v3432_v54, %v4413_v46  ;;  %v598_v57 = vpop.f32.mrb[17].mxu0  ;;  %v858_v58 = vpop.f32.mrb[17].mxu1 }
  0xfa   :  { %v599_v59 = vadd.f32 %v4413_v46, %v598_v57  ;;  %v859_v60 = vadd.f32 %v4413_v46, %v858_v58 }
  0xfb   :  { %1054 = vst [vmem:[#allocation2 + $0x88] sm:$0xff] %v604_v55  ;;  %1106 = vst [vmem:[#allocation2 + $0x228] sm:$0xff] %v864_v56 }
  0xfc   :  { %1053 = vst [vmem:[#allocation2 + $0x80] sm:$0xff] %v599_v59  ;;  %1105 = vst [vmem:[#allocation2 + $0x220] sm:$0xff] %v859_v60  ;;  %v3357_v61 = vpop.f32.mrb[18].mxu0  ;;  %v3435_v62 = vpop.f32.mrb[18].mxu1 }
  0xfd   :  { %v614_v63 = vadd.f32 %v3357_v61, %v4413_v46  ;;  %v874_v0 = vadd.f32 %v3435_v62, %v4413_v46  ;;  %v608_v1 = vpop.f32.mrb[19].mxu0  ;;  %v868_v2 = vpop.f32.mrb[19].mxu1 }
  0xfe   :  { %v609_v3 = vadd.f32 %v4413_v46, %v608_v1  ;;  %v869_v4 = vadd.f32 %v4413_v46, %v868_v2 }
  0xff   :  { %1056 = vst [vmem:[#allocation2 + $0x98] sm:$0xff] %v614_v63  ;;  %1108 = vst [vmem:[#allocation2 + $0x238] sm:$0xff] %v874_v0 }
 0x100   :  { %1055 = vst [vmem:[#allocation2 + $0x90] sm:$0xff] %v609_v3  ;;  %1107 = vst [vmem:[#allocation2 + $0x230] sm:$0xff] %v869_v4  ;;  %v3360_v5 = vpop.f32.mrb[20].mxu0  ;;  %v3438_v6 = vpop.f32.mrb[20].mxu1 }
 0x101   :  { %v624_v7 = vadd.f32 %v3360_v5, %v4413_v46  ;;  %v884_v8 = vadd.f32 %v3438_v6, %v4413_v46  ;;  %v618_v9 = vpop.f32.mrb[21].mxu0  ;;  %v878_v10 = vpop.f32.mrb[21].mxu1 }
 0x102   :  { %v619_v11 = vadd.f32 %v4413_v46, %v618_v9  ;;  %v879_v12 = vadd.f32 %v4413_v46, %v878_v10 }
 0x103   :  { %1058 = vst [vmem:[#allocation2 + $0xa8] sm:$0xff] %v624_v7  ;;  %1110 = vst [vmem:[#allocation2 + $0x248] sm:$0xff] %v884_v8 }
 0x104   :  { %1057 = vst [vmem:[#allocation2 + $0xa0] sm:$0xff] %v619_v11  ;;  %1109 = vst [vmem:[#allocation2 + $0x240] sm:$0xff] %v879_v12  ;;  %v3363_v13 = vpop.f32.mrb[22].mxu0  ;;  %v3441_v14 = vpop.f32.mrb[22].mxu1 }
 0x105   :  { %v634_v15 = vadd.f32 %v3363_v13, %v4413_v46  ;;  %v894_v16 = vadd.f32 %v3441_v14, %v4413_v46  ;;  %v628_v17 = vpop.f32.mrb[23].mxu0  ;;  %v888_v18 = vpop.f32.mrb[23].mxu1 }
 0x106   :  { %v629_v19 = vadd.f32 %v4413_v46, %v628_v17  ;;  %v889_v20 = vadd.f32 %v4413_v46, %v888_v18 }
 0x107   :  { %1060 = vst [vmem:[#allocation2 + $0xb8] sm:$0xff] %v634_v15  ;;  %1112 = vst [vmem:[#allocation2 + $0x258] sm:$0xff] %v894_v16 }
 0x108   :  { %1059 = vst [vmem:[#allocation2 + $0xb0] sm:$0xff] %v629_v19  ;;  %1111 = vst [vmem:[#allocation2 + $0x250] sm:$0xff] %v889_v20  ;;  %v3366_v21 = vpop.f32.mrb[24].mxu0  ;;  %v3444_v22 = vpop.f32.mrb[24].mxu1 }
 0x109   :  { %v644_v23 = vadd.f32 %v3366_v21, %v4413_v46  ;;  %v904_v24 = vadd.f32 %v3444_v22, %v4413_v46  ;;  %v638_v25 = vpop.f32.mrb[25].mxu0  ;;  %v898_v26 = vpop.f32.mrb[25].mxu1 }
 0x10a   :  { %v639_v27 = vadd.f32 %v4413_v46, %v638_v25  ;;  %v899_v28 = vadd.f32 %v4413_v46, %v898_v26 }
 0x10b   :  { %1062 = vst [vmem:[#allocation2 + $0xc8] sm:$0xff] %v644_v23  ;;  %1114 = vst [vmem:[#allocation2 + $0x268] sm:$0xff] %v904_v24 }
 0x10c   :  { %1061 = vst [vmem:[#allocation2 + $0xc0] sm:$0xff] %v639_v27  ;;  %1113 = vst [vmem:[#allocation2 + $0x260] sm:$0xff] %v899_v28  ;;  %v3369_v29 = vpop.f32.mrb[26].mxu0  ;;  %v3447_v30 = vpop.f32.mrb[26].mxu1 }
 0x10d   :  { %v654_v31 = vadd.f32 %v3369_v29, %v4413_v46  ;;  %v914_v32 = vadd.f32 %v3447_v30, %v4413_v46  ;;  %v648_v33 = vpop.f32.mrb[27].mxu0  ;;  %v908_v34 = vpop.f32.mrb[27].mxu1 }
 0x10e   :  { %v649_v35 = vadd.f32 %v4413_v46, %v648_v33  ;;  %v909_v36 = vadd.f32 %v4413_v46, %v908_v34 }
 0x10f   :  { %1064 = vst [vmem:[#allocation2 + $0xd8] sm:$0xff] %v654_v31  ;;  %1116 = vst [vmem:[#allocation2 + $0x278] sm:$0xff] %v914_v32 }
 0x110   :  { %1063 = vst [vmem:[#allocation2 + $0xd0] sm:$0xff] %v649_v35  ;;  %1115 = vst [vmem:[#allocation2 + $0x270] sm:$0xff] %v909_v36  ;;  %v3372_v37 = vpop.f32.mrb[28].mxu0  ;;  %v3450_v38 = vpop.f32.mrb[28].mxu1 }
 0x111   :  { %v664_v39 = vadd.f32 %v3372_v37, %v4413_v46  ;;  %v924_v40 = vadd.f32 %v3450_v38, %v4413_v46  ;;  %v658_v47 = vpop.f32.mrb[29].mxu0  ;;  %v918_v48 = vpop.f32.mrb[29].mxu1 }
 0x112   :  { %v659_v49 = vadd.f32 %v4413_v46, %v658_v47  ;;  %v919_v50 = vadd.f32 %v4413_v46, %v918_v48 }
 0x113   :  { %1066 = vst [vmem:[#allocation2 + $0xe8] sm:$0xff] %v664_v39  ;;  %1118 = vst [vmem:[#allocation2 + $0x288] sm:$0xff] %v924_v40 }
 0x114   :  { %1065 = vst [vmem:[#allocation2 + $0xe0] sm:$0xff] %v659_v49  ;;  %1117 = vst [vmem:[#allocation2 + $0x280] sm:$0xff] %v919_v50  ;;  %v3375_v51 = vpop.f32.mrb[30].mxu0  ;;  %v3453_v52 = vpop.f32.mrb[30].mxu1 }
 0x115   :  { %v674_v53 = vadd.f32 %v3375_v51, %v4413_v46  ;;  %v934_v54 = vadd.f32 %v3453_v52, %v4413_v46  ;;  %v668_v55 = vpop.f32.mrb[31].mxu0  ;;  %v928_v56 = vpop.f32.mrb[31].mxu1 }
 0x116   :  { %v669_v57 = vadd.f32 %v4413_v46, %v668_v55  ;;  %v929_v58 = vadd.f32 %v4413_v46, %v928_v56 }
 0x117   :  { %1068 = vst [vmem:[#allocation2 + $0xf8] sm:$0xff] %v674_v53  ;;  %1120 = vst [vmem:[#allocation2 + $0x298] sm:$0xff] %v934_v54 }
 0x118   :  { %1067 = vst [vmem:[#allocation2 + $0xf0] sm:$0xff] %v669_v57  ;;  %1119 = vst [vmem:[#allocation2 + $0x290] sm:$0xff] %v929_v58  ;;  %v3378_v59 = vpop.f32.mrb[32].mxu0  ;;  %v3456_v60 = vpop.f32.mrb[32].mxu1 }
 0x119   :  { %v684_v61 = vadd.f32 %v3378_v59, %v4413_v46  ;;  %v944_v62 = vadd.f32 %v3456_v60, %v4413_v46  ;;  %v678_v63 = vpop.f32.mrb[33].mxu0  ;;  %v938_v0 = vpop.f32.mrb[33].mxu1 }
 0x11a   :  { %v679_v1 = vadd.f32 %v4413_v46, %v678_v63  ;;  %v939_v2 = vadd.f32 %v4413_v46, %v938_v0 }
 0x11b   :  { %1070 = vst [vmem:[#allocation2 + $0x108] sm:$0xff] %v684_v61  ;;  %1122 = vst [vmem:[#allocation2 + $0x2a8] sm:$0xff] %v944_v62 }
 0x11c   :  { %1069 = vst [vmem:[#allocation2 + $0x100] sm:$0xff] %v679_v1  ;;  %1121 = vst [vmem:[#allocation2 + $0x2a0] sm:$0xff] %v939_v2  ;;  %v3381_v3 = vpop.f32.mrb[34].mxu0  ;;  %v3459_v4 = vpop.f32.mrb[34].mxu1 }
 0x11d   :  { %v694_v5 = vadd.f32 %v3381_v3, %v4413_v46  ;;  %v954_v6 = vadd.f32 %v3459_v4, %v4413_v46  ;;  %v688_v7 = vpop.f32.mrb[35].mxu0  ;;  %v948_v8 = vpop.f32.mrb[35].mxu1 }
 0x11e   :  { %v689_v9 = vadd.f32 %v4413_v46, %v688_v7  ;;  %v949_v10 = vadd.f32 %v4413_v46, %v948_v8 }
 0x11f   :  { %1072 = vst [vmem:[#allocation2 + $0x118] sm:$0xff] %v694_v5  ;;  %1124 = vst [vmem:[#allocation2 + $0x2b8] sm:$0xff] %v954_v6 }
 0x120   :  { %1071 = vst [vmem:[#allocation2 + $0x110] sm:$0xff] %v689_v9  ;;  %1123 = vst [vmem:[#allocation2 + $0x2b0] sm:$0xff] %v949_v10  ;;  %v3384_v11 = vpop.f32.mrb[36].mxu0  ;;  %v3462_v12 = vpop.f32.mrb[36].mxu1 }
 0x121   :  { %v704_v13 = vadd.f32 %v3384_v11, %v4413_v46  ;;  %v964_v14 = vadd.f32 %v3462_v12, %v4413_v46  ;;  %v698_v15 = vpop.f32.mrb[37].mxu0  ;;  %v958_v16 = vpop.f32.mrb[37].mxu1 }
 0x122   :  { %v699_v17 = vadd.f32 %v4413_v46, %v698_v15  ;;  %v959_v18 = vadd.f32 %v4413_v46, %v958_v16 }
 0x123   :  { %1074 = vst [vmem:[#allocation2 + $0x128] sm:$0xff] %v704_v13  ;;  %1126 = vst [vmem:[#allocation2 + $0x2c8] sm:$0xff] %v964_v14 }
 0x124   :  { %1073 = vst [vmem:[#allocation2 + $0x120] sm:$0xff] %v699_v17  ;;  %1125 = vst [vmem:[#allocation2 + $0x2c0] sm:$0xff] %v959_v18  ;;  %v3387_v19 = vpop.f32.mrb[38].mxu0  ;;  %v3465_v20 = vpop.f32.mrb[38].mxu1  ;;  %v4519_v17 = vmov 0.0  }
 0x125   :  { %v714_v21 = vadd.f32 %v3387_v19, %v4413_v46  ;;  %v974_v22 = vadd.f32 %v3465_v20, %v4413_v46  ;;  %v708_v23 = vpop.f32.mrb[39].mxu0  ;;  %v968_v24 = vpop.f32.mrb[39].mxu1 }
 0x126   :  { %v709_v25 = vadd.f32 %v4413_v46, %v708_v23  ;;  %v969_v26 = vadd.f32 %v4413_v46, %v968_v24 }
 0x127   :  { %1076 = vst [vmem:[#allocation2 + $0x138] sm:$0xff] %v714_v21  ;;  %1128 = vst [vmem:[#allocation2 + $0x2d8] sm:$0xff] %v974_v22 }
 0x128   :  { %1075 = vst [vmem:[#allocation2 + $0x130] sm:$0xff] %v709_v25  ;;  %1127 = vst [vmem:[#allocation2 + $0x2d0] sm:$0xff] %v969_v26  ;;  %v3390_v27 = vpop.f32.mrb[40].mxu0  ;;  %v3468_v28 = vpop.f32.mrb[40].mxu1 }
 0x129   :  { %v724_v29 = vadd.f32 %v3390_v27, %v4413_v46  ;;  %v984_v30 = vadd.f32 %v3468_v28, %v4413_v46  ;;  %v718_v31 = vpop.f32.mrb[41].mxu0  ;;  %v978_v32 = vpop.f32.mrb[41].mxu1 }
 0x12a   :  { %v719_v33 = vadd.f32 %v4413_v46, %v718_v31  ;;  %v979_v34 = vadd.f32 %v4413_v46, %v978_v32 }
 0x12b   :  { %1078 = vst [vmem:[#allocation2 + $0x148] sm:$0xff] %v724_v29  ;;  %1130 = vst [vmem:[#allocation2 + $0x2e8] sm:$0xff] %v984_v30 }
 0x12c   :  { %1077 = vst [vmem:[#allocation2 + $0x140] sm:$0xff] %v719_v33  ;;  %1129 = vst [vmem:[#allocation2 + $0x2e0] sm:$0xff] %v979_v34  ;;  %v3393_v35 = vpop.f32.mrb[42].mxu0  ;;  %v3471_v36 = vpop.f32.mrb[42].mxu1 }
 0x12d   :  { %v734_v37 = vadd.f32 %v3393_v35, %v4413_v46  ;;  %v994_v38 = vadd.f32 %v3471_v36, %v4413_v46  ;;  %v728_v39 = vpop.f32.mrb[43].mxu0  ;;  %v988_v40 = vpop.f32.mrb[43].mxu1 }
 0x12e   :  { %v729_v47 = vadd.f32 %v4413_v46, %v728_v39  ;;  %v989_v48 = vadd.f32 %v4413_v46, %v988_v40 }
 0x12f   :  { %1080 = vst [vmem:[#allocation2 + $0x158] sm:$0xff] %v734_v37  ;;  %1132 = vst [vmem:[#allocation2 + $0x2f8] sm:$0xff] %v994_v38 }
 0x130   :  { %1079 = vst [vmem:[#allocation2 + $0x150] sm:$0xff] %v729_v47  ;;  %1131 = vst [vmem:[#allocation2 + $0x2f0] sm:$0xff] %v989_v48  ;;  %v3396_v49 = vpop.f32.mrb[44].mxu0  ;;  %v3474_v50 = vpop.f32.mrb[44].mxu1 }
 0x131   :  { %v744_v51 = vadd.f32 %v3396_v49, %v4413_v46  ;;  %v1004_v52 = vadd.f32 %v3474_v50, %v4413_v46  ;;  %v738_v53 = vpop.f32.mrb[45].mxu0  ;;  %v998_v54 = vpop.f32.mrb[45].mxu1 }
 0x132   :  { %v739_v55 = vadd.f32 %v4413_v46, %v738_v53  ;;  %v999_v56 = vadd.f32 %v4413_v46, %v998_v54 }
 0x133   :  { %1082 = vst [vmem:[#allocation2 + $0x168] sm:$0xff] %v744_v51  ;;  %1134 = vst [vmem:[#allocation2 + $0x308] sm:$0xff] %v1004_v52 }
 0x134   :  { %1081 = vst [vmem:[#allocation2 + $0x160] sm:$0xff] %v739_v55  ;;  %1133 = vst [vmem:[#allocation2 + $0x300] sm:$0xff] %v999_v56  ;;  %v3399_v57 = vpop.f32.mrb[46].mxu0  ;;  %v3477_v58 = vpop.f32.mrb[46].mxu1 }
 0x135   :  { %v754_v59 = vadd.f32 %v3399_v57, %v4413_v46  ;;  %v1014_v60 = vadd.f32 %v3477_v58, %v4413_v46  ;;  %v748_v61 = vpop.f32.mrb[47].mxu0  ;;  %v1008_v62 = vpop.f32.mrb[47].mxu1 }
 0x136   :  { %v749_v63 = vadd.f32 %v4413_v46, %v748_v61  ;;  %v1009_v0 = vadd.f32 %v4413_v46, %v1008_v62 }
 0x137   :  { %1084 = vst [vmem:[#allocation2 + $0x178] sm:$0xff] %v754_v59  ;;  %1136 = vst [vmem:[#allocation2 + $0x318] sm:$0xff] %v1014_v60 }
 0x138   :  { %1083 = vst [vmem:[#allocation2 + $0x170] sm:$0xff] %v749_v63  ;;  %1135 = vst [vmem:[#allocation2 + $0x310] sm:$0xff] %v1009_v0  ;;  %v3402_v1 = vpop.f32.mrb[48].mxu0  ;;  %v3480_v2 = vpop.f32.mrb[48].mxu1 }
 0x139   :  { %v764_v3 = vadd.f32 %v3402_v1, %v4413_v46  ;;  %v1024_v4 = vadd.f32 %v3480_v2, %v4413_v46  ;;  %v758_v5 = vpop.f32.mrb[49].mxu0  ;;  %v1018_v6 = vpop.f32.mrb[49].mxu1 }
 0x13a   :  { %v759_v7 = vadd.f32 %v4413_v46, %v758_v5  ;;  %v1019_v8 = vadd.f32 %v4413_v46, %v1018_v6 }
 0x13b   :  { %1086 = vst [vmem:[#allocation2 + $0x188] sm:$0xff] %v764_v3  ;;  %1138 = vst [vmem:[#allocation2 + $0x328] sm:$0xff] %v1024_v4 }
 0x13c   :  { %1085 = vst [vmem:[#allocation2 + $0x180] sm:$0xff] %v759_v7  ;;  %1137 = vst [vmem:[#allocation2 + $0x320] sm:$0xff] %v1019_v8  ;;  %v3405_v9 = vpop.f32.mrb[50].mxu0  ;;  %v3483_v10 = vpop.f32.mrb[50].mxu1 }
 0x13d   :  { %v774_v11 = vadd.f32 %v3405_v9, %v4413_v46  ;;  %v1034_v12 = vadd.f32 %v3483_v10, %v4413_v46  ;;  %v768_v13 = vpop.f32.mrb[51].mxu0  ;;  %v1028_v14 = vpop.f32.mrb[51].mxu1 }
 0x13e   :  { %v769_v15 = vadd.f32 %v4413_v46, %v768_v13  ;;  %v1029_v16 = vadd.f32 %v4413_v46, %v1028_v14 }
 0x13f   :  { %1088 = vst [vmem:[#allocation2 + $0x198] sm:$0xff] %v774_v11  ;;  %1140 = vst [vmem:[#allocation2 + $0x338] sm:$0xff] %v1034_v12 }
 0x140   :  { %1087 = vst [vmem:[#allocation2 + $0x190] sm:$0xff] %v769_v15  ;;  %1139 = vst [vmem:[#allocation2 + $0x330] sm:$0xff] %v1029_v16 }
 0x141 LB: > { %v4529_v18 = vpack.c.bf16 %v4393_v42, %v4388_v41  ;;  %v3917_v46 = vmov 0.0|0.0   ;;  %s3918_s3 = smov 96   ;;  %v4537_v19 = vpack.c.bf16 %v4403_v44, %v4398_v43  ;;  %vm3919_vm1 = vmmov 0   ;;  %s3921_s4 = smov 64   ;;  %s3907_s2 = sphi %s4521_s2, %s1151_s2   ;;  %v3903_v17 = vphi %v4519_v17, %v2021_v17  }
 0x142   : > { %3660 = vmatprep.subr.bf16.mxu0 %v3917_v46  ;;  %3666 = vmatprep.subr.bf16.mxu1 %v3917_v46  ;;  %v3920_v20 = vmov 0.0   ;;  %vm1166_vm2 = vcmask 261120   ;;  %s2974_s29 = sshll.u32 %s3907_s2, 6  ;;  %s1151_s2 = sadd.s32 1, %s3907_s2  }
 0x143   : > { %1164 = vrot.lane.b32.xlu0 %v3903_v17, %s3918_s3  ;;  %3662 = vmatpush3.bf16.msra.mxu0 %v4529_v18  ;;  %s4560_s30 = scalar_lea.vmem [#allocation2], %s2974_s29  ;;  %s4566_s8 = scalar_lea.vmem [#allocation3], %s2974_s29 }
 0x144   : > { %3663 = vmatprep.subr.bf16.mxu0 %v3917_v46  ;;  %3492 = vmatprep.mubr.msk.f32.mxu0 %vm3919_vm1, %v3920_v20  ;;  %p1148_p0 = scmp.ge.s32.totalorder %s1151_s2, 13  }
 0x145   : > { %3668 = vmatpush3.bf16.msra.mxu1 %v4529_v18  ;;  %3503 = vmatprep.mubr.msk.f32.mxu1 %vm3919_vm1, %v3920_v20  ;;  %s4668_s9 = smov (%p1148_p0), 0  }
 0x146   : > { %3669 = vmatprep.subr.bf16.mxu1 %v3917_v46 }
 0x147   : > { %3665 = vmatpush3.bf16.msra.mxu0 %v4537_v19  ;;  %v1156_v25 = vld [vmem:[%s4560_s30] sm:$0xff]  ;;  %v2981_v51 = vld [vmem:[%s4560_s30 + $0x8] sm:$0xff]  ;;  %v2989_v7 = vld [vmem:[%s4560_s30 + $0x10] sm:$0xff] }
 0x148   : > { %3672 = vmatprep.subr.bf16.mxu0 %v3917_v46 }
 0x149   : > { %3671 = vmatpush3.bf16.msra.mxu1 %v4537_v19 }
 0x14a   : > { %3678 = vmatprep.subr.bf16.mxu1 %v3917_v46 }
 0x1b5   : > { %v1165_v21 = vpop.permute.xlu0 %1164 }
 0x1b6   : > { %3493 = vmatmul.mubr.msk.f32.vlgmr.msra.gmra.mrb[0].mxu0 %vm1166_vm2, %v1165_v21 }
 0x1b7   : > { %3674 = vmatpush3.bf16.msra.mxu0 %v4529_v18  ;;  %3514 = vmatprep.mubr.msk.f32.mxu0 %vm3919_vm1, %v3920_v20 }
 0x1b8   : > { %3675 = vmatprep.subr.bf16.mxu0 %v3917_v46 }
 0x1bb   : > { %3677 = vmatpush3.bf16.msra.mxu0 %v4537_v19 }
 0x1bc   : > { %3684 = vmatprep.subr.bf16.mxu0 %v3917_v46 }
 0x289   : > { %v1235_v22 = vpop.f32.mrb[0].mxu0 }
 0x28a   : > { %v1236_v23 = vadd.f32 %v4408_v45, %v1235_v22  ;;  %v3494_v24 = vpop.f32.mrb[1].mxu0 }
 0x28c   : > { %1247 = vrot.lane.b32.xlu0 %v1236_v23, %s3921_s4  ;;  %v1239_v26 = vadd.f32 %v1236_v23, %v1156_v25 }
 0x28e   : > { %v2977_v27 = vmul.f32 -1.442695, %v1239_v26 }
 0x290   : > { %3813 = vpow2.f32 %v2977_v27 }
 0x29a   : > { %v3814_v28 = vpop.eup %3813 }
 0x29b   : > { %v1243_v29 = vadd.f32 1.0, %v3814_v28 }
 0x29d   : > { %3815 = vrcp.f32 %v1243_v29 }
 0x2a7   : > { %v3816_v30 = vpop.eup %3815 }
 0x2a8   : > { %v1257_v36 = vsub.f32 1.0, %v3816_v30  ;;  %v1263_v38 = vmul.f32 %v3903_v17, %v3816_v30 }
 0x2fe   : > { %v1248_v31 = vpop.permute.xlu0 %1247 }
 0x2ff   : > { %v1250_v32 = vmul.f32 %v3816_v30, %v1248_v31  ;;  %v2997_v30 = vld [vmem:[%s4560_s30 + $0x18] sm:$0xff] }
 0x301   : > { %1252 = vrot.lane.b32.xlu1 %v1250_v32, %s3921_s4 }
 0x373   : > { %v1253_v33 = vpop.permute.xlu1 %1252 }
 0x374   : > { %v1255_v34 = vadd.f32 %v1253_v33, %v1156_v25 }
 0x376   : > { %3817 = vtanh.f32 %v1255_v34 }
 0x380   : > { %v3818_v35 = vpop.eup %3817 }
 0x381   : > { %1259 = vrot.lane.b32.xlu1 %v3818_v35, %s3918_s3 }
 0x3f3   : > { %v1260_v37 = vpop.permute.xlu1 %1259 }
 0x3f4   : > { %v1262_v39 = vmul.f32 %v1260_v37, %v1257_v36 }
 0x3f6   : > { %v1264_v40 = vadd.f32 %v1263_v38, %v1262_v39 }
 0x3f8   : > { %1266 = vrot.lane.b32.xlu0 %v1264_v40, %s3918_s3 }
 0x46a   : > { %v1267_v47 = vpop.permute.xlu0 %1266 }
 0x46b   : > { %1271 = vst.msk [vmem:[%s4566_s8] sm:$0xff] %vm1166_vm2, %v1267_v47  ;;  %3504 = vmatmul.mubr.msk.f32.vlgmr.msra.gmra.mrb[0].mxu1 %vm1166_vm2, %v1267_v47 }
 0x46c   : > { %3680 = vmatpush3.bf16.msra.mxu1 %v4529_v18  ;;  %3525 = vmatprep.mubr.msk.f32.mxu1 %vm3919_vm1, %v3920_v20 }
 0x46d   : > { %3681 = vmatprep.subr.bf16.mxu1 %v3917_v46 }
 0x470   : > { %3683 = vmatpush3.bf16.msra.mxu1 %v4537_v19 }
 0x471   : > { %3690 = vmatprep.subr.bf16.mxu1 %v3917_v46 }
 0x53e   : > { %v1344_v48 = vpop.f32.mrb[0].mxu1 }
 0x53f   : > { %v1345_v49 = vadd.f32 %v4408_v45, %v1344_v48  ;;  %v3505_v50 = vpop.f32.mrb[1].mxu1 }
 0x541   : > { %1356 = vrot.lane.b32.xlu1 %v1345_v49, %s3921_s4  ;;  %v1348_v52 = vadd.f32 %v2981_v51, %v1345_v49 }
 0x543   : > { %v2983_v53 = vmul.f32 -1.442695, %v1348_v52 }
 0x545   : > { %3819 = vpow2.f32 %v2983_v53 }
 0x54f   : > { %v3820_v54 = vpop.eup %3819 }
 0x550   : > { %v1352_v55 = vadd.f32 1.0, %v3820_v54 }
 0x552   : > { %3821 = vrcp.f32 %v1352_v55 }
 0x55c   : > { %v3822_v56 = vpop.eup %3821 }
 0x55d   : > { %v1366_v62 = vsub.f32 1.0, %v3822_v56  ;;  %v1372_v0 = vmul.f32 %v3822_v56, %v1264_v40 }
 0x5b3   : > { %v1357_v57 = vpop.permute.xlu1 %1356 }
 0x5b4   : > { %v1359_v58 = vmul.f32 %v3822_v56, %v1357_v57  ;;  %v3005_v56 = vld [vmem:[%s4560_s30 + $0x20] sm:$0xff] }
 0x5b6   : > { %1361 = vrot.lane.b32.xlu0 %v1359_v58, %s3921_s4 }
 0x628   : > { %v1362_v59 = vpop.permute.xlu0 %1361 }
 0x629   : > { %v1364_v60 = vadd.f32 %v2981_v51, %v1362_v59 }
 0x62b   : > { %3823 = vtanh.f32 %v1364_v60 }
 0x635   : > { %v3824_v61 = vpop.eup %3823 }
 0x636   : > { %1368 = vrot.lane.b32.xlu1 %v3824_v61, %s3918_s3 }
 0x6a8   : > { %v1369_v63 = vpop.permute.xlu1 %1368 }
 0x6a9   : > { %v1371_v1 = vmul.f32 %v1369_v63, %v1366_v62 }
 0x6ab   : > { %v1373_v2 = vadd.f32 %v1372_v0, %v1371_v1 }
 0x6ad   : > { %1375 = vrot.lane.b32.xlu0 %v1373_v2, %s3918_s3 }
 0x71f   : > { %v1376_v3 = vpop.permute.xlu0 %1375 }
 0x720   : > { %2986 = vst.msk [vmem:[%s4566_s8 + $0x8] sm:$0xff] %vm1166_vm2, %v1376_v3  ;;  %3515 = vmatmul.mubr.msk.f32.vlgmr.msra.gmra.mrb[2].mxu0 %vm1166_vm2, %v1376_v3 }
 0x721   : > { %3686 = vmatpush3.bf16.msra.mxu0 %v4529_v18  ;;  %3536 = vmatprep.mubr.msk.f32.mxu0 %vm3919_vm1, %v3920_v20 }
 0x722   : > { %3687 = vmatprep.subr.bf16.mxu0 %v3917_v46 }
 0x725   : > { %3689 = vmatpush3.bf16.msra.mxu0 %v4537_v19 }
 0x726   : > { %3696 = vmatprep.subr.bf16.mxu0 %v3917_v46 }
 0x7f3   : > { %v1452_v4 = vpop.f32.mrb[2].mxu0 }
 0x7f4   : > { %v1453_v5 = vadd.f32 %v4408_v45, %v1452_v4  ;;  %v3516_v6 = vpop.f32.mrb[3].mxu0 }
 0x7f6   : > { %1464 = vrot.lane.b32.xlu1 %v1453_v5, %s3921_s4  ;;  %v1456_v8 = vadd.f32 %v2989_v7, %v1453_v5 }
 0x7f8   : > { %v2991_v9 = vmul.f32 -1.442695, %v1456_v8 }
 0x7fa   : > { %3825 = vpow2.f32 %v2991_v9 }
 0x804   : > { %v3826_v10 = vpop.eup %3825 }
 0x805   : > { %v1460_v11 = vadd.f32 1.0, %v3826_v10 }
 0x807   : > { %3827 = vrcp.f32 %v1460_v11 }
 0x811   : > { %v3828_v12 = vpop.eup %3827 }
 0x812   : > { %v1474_v21 = vsub.f32 1.0, %v3828_v12  ;;  %v1480_v23 = vmul.f32 %v3828_v12, %v1373_v2 }
 0x868   : > { %v1465_v13 = vpop.permute.xlu1 %1464 }
 0x869   : > { %v1467_v14 = vmul.f32 %v3828_v12, %v1465_v13  ;;  %v3013_v12 = vld [vmem:[%s4560_s30 + $0x28] sm:$0xff] }
 0x86b   : > { %1469 = vrot.lane.b32.xlu0 %v1467_v14, %s3921_s4 }
 0x8dd   : > { %v1470_v15 = vpop.permute.xlu0 %1469 }
 0x8de   : > { %v1472_v16 = vadd.f32 %v2989_v7, %v1470_v15 }
 0x8e0   : > { %3829 = vtanh.f32 %v1472_v16 }
 0x8ea   : > { %v3830_v17 = vpop.eup %3829 }
 0x8eb   : > { %1476 = vrot.lane.b32.xlu1 %v3830_v17, %s3918_s3 }
 0x95d   : > { %v1477_v22 = vpop.permute.xlu1 %1476 }
 0x95e   : > { %v1479_v24 = vmul.f32 %v1477_v22, %v1474_v21 }
 0x960   : > { %v1481_v25 = vadd.f32 %v1480_v23, %v1479_v24 }
 0x962   : > { %1483 = vrot.lane.b32.xlu0 %v1481_v25, %s3918_s3 }
 0x9d4   : > { %v1484_v26 = vpop.permute.xlu0 %1483 }
 0x9d5   : > { %2994 = vst.msk [vmem:[%s4566_s8 + $0x10] sm:$0xff] %vm1166_vm2, %v1484_v26  ;;  %3526 = vmatmul.mubr.msk.f32.vlgmr.msra.gmra.mrb[2].mxu1 %vm1166_vm2, %v1484_v26 }
 0x9d6   : > { %3692 = vmatpush3.bf16.msra.mxu1 %v4529_v18  ;;  %3547 = vmatprep.mubr.msk.f32.mxu1 %vm3919_vm1, %v3920_v20 }
 0x9d7   : > { %3693 = vmatprep.subr.bf16.mxu1 %v3917_v46 }
 0x9da   : > { %3695 = vmatpush3.bf16.msra.mxu1 %v4537_v19 }
 0x9db   : > { %3702 = vmatprep.subr.bf16.mxu1 %v3917_v46 }
 0xaa8   : > { %v1560_v27 = vpop.f32.mrb[2].mxu1 }
 0xaa9   : > { %v1561_v28 = vadd.f32 %v4408_v45, %v1560_v27  ;;  %v3527_v29 = vpop.f32.mrb[3].mxu1 }
 0xaab   : > { %1572 = vrot.lane.b32.xlu1 %v1561_v28, %s3921_s4  ;;  %v1564_v31 = vadd.f32 %v2997_v30, %v1561_v28 }
 0xaad   : > { %v2999_v32 = vmul.f32 -1.442695, %v1564_v31  ;;  %v3021_v31 = vld [vmem:[%s4560_s30 + $0x30] sm:$0xff] }
 0xaaf   : > { %3831 = vpow2.f32 %v2999_v32 }
 0xab9   : > { %v3832_v33 = vpop.eup %3831 }
 0xaba   : > { %v1568_v34 = vadd.f32 1.0, %v3832_v33 }
 0xabc   : > { %3833 = vrcp.f32 %v1568_v34 }
 0xac6   : > { %v3834_v35 = vpop.eup %3833 }
 0xac7   : > { %v1582_v47 = vsub.f32 1.0, %v3834_v35  ;;  %v1588_v49 = vmul.f32 %v3834_v35, %v1481_v25 }
 0xb1d   : > { %v1573_v36 = vpop.permute.xlu1 %1572 }
 0xb1e   : > { %v1575_v37 = vmul.f32 %v3834_v35, %v1573_v36 }
 0xb20   : > { %1577 = vrot.lane.b32.xlu0 %v1575_v37, %s3921_s4 }
 0xb92   : > { %v1578_v38 = vpop.permute.xlu0 %1577 }
 0xb93   : > { %v1580_v39 = vadd.f32 %v2997_v30, %v1578_v38 }
 0xb95   : > { %3835 = vtanh.f32 %v1580_v39 }
 0xb9f   : > { %v3836_v40 = vpop.eup %3835 }
 0xba0   : > { %1584 = vrot.lane.b32.xlu1 %v3836_v40, %s3918_s3 }
 0xc12   : > { %v1585_v48 = vpop.permute.xlu1 %1584 }
 0xc13   : > { %v1587_v50 = vmul.f32 %v1585_v48, %v1582_v47 }
 0xc15   : > { %v1589_v51 = vadd.f32 %v1588_v49, %v1587_v50 }
 0xc17   : > { %1591 = vrot.lane.b32.xlu0 %v1589_v51, %s3918_s3 }
 0xc89   : > { %v1592_v52 = vpop.permute.xlu0 %1591 }
 0xc8a   : > { %3002 = vst.msk [vmem:[%s4566_s8 + $0x18] sm:$0xff] %vm1166_vm2, %v1592_v52  ;;  %3537 = vmatmul.mubr.msk.f32.vlgmr.msra.gmra.mrb[4].mxu0 %vm1166_vm2, %v1592_v52 }
 0xc8b   : > { %3698 = vmatpush3.bf16.msra.mxu0 %v4529_v18  ;;  %3558 = vmatprep.mubr.msk.f32.mxu0 %vm3919_vm1, %v3920_v20 }
 0xc8c   : > { %3699 = vmatprep.subr.bf16.mxu0 %v3917_v46 }
 0xc8f   : > { %3701 = vmatpush3.bf16.msra.mxu0 %v4537_v19 }
 0xd5d   : > { %v1668_v53 = vpop.f32.mrb[4].mxu0 }
 0xd5e   : > { %v1669_v54 = vadd.f32 %v4408_v45, %v1668_v53  ;;  %v3538_v55 = vpop.f32.mrb[5].mxu0 }
 0xd60   : > { %1680 = vrot.lane.b32.xlu1 %v1669_v54, %s3921_s4  ;;  %v1672_v57 = vadd.f32 %v3005_v56, %v1669_v54 }
 0xd62   : > { %v3007_v58 = vmul.f32 -1.442695, %v1672_v57  ;;  %v3029_v57 = vld [vmem:[%s4560_s30 + $0x38] sm:$0xff] }
 0xd64   : > { %3837 = vpow2.f32 %v3007_v58 }
 0xd6e   : > { %v3838_v59 = vpop.eup %3837 }
 0xd6f   : > { %v1676_v60 = vadd.f32 1.0, %v3838_v59 }
 0xd71   : > { %3839 = vrcp.f32 %v1676_v60 }
 0xd7b   : > { %v3840_v61 = vpop.eup %3839 }
 0xd7c   : > { %v1690_v3 = vsub.f32 1.0, %v3840_v61  ;;  %v1696_v5 = vmul.f32 %v3840_v61, %v1589_v51 }
 0xdd2   : > { %v1681_v62 = vpop.permute.xlu1 %1680 }
 0xdd3   : > { %v1683_v63 = vmul.f32 %v3840_v61, %v1681_v62 }
 0xdd5   : > { %1685 = vrot.lane.b32.xlu0 %v1683_v63, %s3921_s4 }
 0xe47   : > { %v1686_v0 = vpop.permute.xlu0 %1685 }
 0xe48   : > { %v1688_v1 = vadd.f32 %v3005_v56, %v1686_v0 }
 0xe4a   : > { %3841 = vtanh.f32 %v1688_v1 }
 0xe54   : > { %v3842_v2 = vpop.eup %3841 }
 0xe55   : > { %1692 = vrot.lane.b32.xlu1 %v3842_v2, %s3918_s3 }
 0xec7   : > { %v1693_v4 = vpop.permute.xlu1 %1692 }
 0xec8   : > { %v1695_v6 = vmul.f32 %v1693_v4, %v1690_v3 }
 0xeca   : > { %v1697_v7 = vadd.f32 %v1696_v5, %v1695_v6 }
 0xecc   : > { %1699 = vrot.lane.b32.xlu0 %v1697_v7, %s3918_s3 }
 0xf3e   : > { %v1700_v8 = vpop.permute.xlu0 %1699 }
 0xf3f   : > { %3010 = vst.msk [vmem:[%s4566_s8 + $0x20] sm:$0xff] %vm1166_vm2, %v1700_v8  ;;  %3548 = vmatmul.mubr.msk.f32.vlgmr.msra.gmra.mrb[4].mxu1 %vm1166_vm2, %v1700_v8 }
 0xf40   : > { %3704 = vmatpush3.bf16.msra.mxu1 %v4529_v18  ;;  %3569 = vmatprep.mubr.msk.f32.mxu1 %vm3919_vm1, %v3920_v20 }
 0xf41   : > { %3705 = vmatprep.subr.bf16.mxu1 %v3917_v46 }
 0xf44   : > { %3707 = vmatpush3.bf16.msra.mxu1 %v4537_v19 }
0x1012   : > { %v1776_v9 = vpop.f32.mrb[4].mxu1 }
0x1013   : > { %v1777_v10 = vadd.f32 %v4408_v45, %v1776_v9  ;;  %v3549_v11 = vpop.f32.mrb[5].mxu1  ;;  %v4666_v9 = vmov (%p1148_p0), 0.0  }
0x1015   : > { %1788 = vrot.lane.b32.xlu1 %v1777_v10, %s3921_s4  ;;  %v1780_v13 = vadd.f32 %v3013_v12, %v1777_v10 }
0x1017   : > { %v3015_v14 = vmul.f32 -1.442695, %v1780_v13 }
0x1019   : > { %3843 = vpow2.f32 %v3015_v14 }
0x1023   : > { %v3844_v15 = vpop.eup %3843 }
0x1024   : > { %v1784_v16 = vadd.f32 1.0, %v3844_v15 }
0x1026   : > { %3845 = vrcp.f32 %v1784_v16 }
0x1030   : > { %v3846_v18 = vpop.eup %3845 }
0x1031   : > { %v1798_v22 = vsub.f32 1.0, %v3846_v18  ;;  %v1804_v24 = vmul.f32 %v3846_v18, %v1697_v7 }
0x1087   : > { %v1789_v20 = vpop.permute.xlu1 %1788 }
0x1088   : > { %v1791_v17 = vmul.f32 %v3846_v18, %v1789_v20 }
0x108a   : > { %1793 = vrot.lane.b32.xlu0 %v1791_v17, %s3921_s4 }
0x10fc   : > { %v1794_v46 = vpop.permute.xlu0 %1793 }
0x10fd   : > { %v1796_v19 = vadd.f32 %v3013_v12, %v1794_v46 }
0x10ff   : > { %3847 = vtanh.f32 %v1796_v19 }
0x1109   : > { %v3848_v21 = vpop.eup %3847 }
0x110a   : > { %1800 = vrot.lane.b32.xlu1 %v3848_v21, %s3918_s3 }
0x117c   : > { %v1801_v23 = vpop.permute.xlu1 %1800 }
0x117d   : > { %v1803_v25 = vmul.f32 %v1801_v23, %v1798_v22 }
0x117f   : > { %v1805_v26 = vadd.f32 %v1804_v24, %v1803_v25 }
0x1181   : > { %1807 = vrot.lane.b32.xlu0 %v1805_v26, %s3918_s3 }
0x11f3   : > { %v1808_v27 = vpop.permute.xlu0 %1807 }
0x11f4   : > { %3018 = vst.msk [vmem:[%s4566_s8 + $0x28] sm:$0xff] %vm1166_vm2, %v1808_v27  ;;  %3559 = vmatmul.mubr.msk.f32.vlgmr.msra.gmra.mrb[6].mxu0 %vm1166_vm2, %v1808_v27 }
0x12c7   : > { %v1884_v28 = vpop.f32.mrb[6].mxu0 }
0x12c8   : > { %v1885_v29 = vadd.f32 %v4408_v45, %v1884_v28  ;;  %v3560_v30 = vpop.f32.mrb[7].mxu0 }
0x12ca   : > { %1896 = vrot.lane.b32.xlu1 %v1885_v29, %s3921_s4  ;;  %v1888_v32 = vadd.f32 %v3021_v31, %v1885_v29 }
0x12cc   : > { %v3023_v33 = vmul.f32 -1.442695, %v1888_v32 }
0x12ce   : > { %3849 = vpow2.f32 %v3023_v33 }
0x12d8   : > { %v3850_v34 = vpop.eup %3849 }
0x12d9   : > { %v1892_v35 = vadd.f32 1.0, %v3850_v34 }
0x12db   : > { %3851 = vrcp.f32 %v1892_v35 }
0x12e5   : > { %v3852_v36 = vpop.eup %3851 }
0x12e6   : > { %v1906_v48 = vsub.f32 1.0, %v3852_v36  ;;  %v1912_v50 = vmul.f32 %v3852_v36, %v1805_v26 }
0x133c   : > { %v1897_v37 = vpop.permute.xlu1 %1896 }
0x133d   : > { %v1899_v38 = vmul.f32 %v3852_v36, %v1897_v37 }
0x133f   : > { %1901 = vrot.lane.b32.xlu0 %v1899_v38, %s3921_s4 }
0x13b1   : > { %v1902_v39 = vpop.permute.xlu0 %1901 }
0x13b2   : > { %v1904_v40 = vadd.f32 %v3021_v31, %v1902_v39 }
0x13b4   : > { %3853 = vtanh.f32 %v1904_v40 }
0x13be   : > { %v3854_v47 = vpop.eup %3853 }
0x13bf   : > { %1908 = vrot.lane.b32.xlu1 %v3854_v47, %s3918_s3 }
0x1431   : > { %v1909_v49 = vpop.permute.xlu1 %1908 }
0x1432   : > { %v1911_v51 = vmul.f32 %v1909_v49, %v1906_v48 }
0x1434   : > { %v1913_v52 = vadd.f32 %v1912_v50, %v1911_v51 }
0x1436   : > { %1915 = vrot.lane.b32.xlu0 %v1913_v52, %s3918_s3 }
0x14a8   : > { %v1916_v53 = vpop.permute.xlu0 %1915 }
0x14a9   : > { %3026 = vst.msk [vmem:[%s4566_s8 + $0x30] sm:$0xff] %vm1166_vm2, %v1916_v53  ;;  %3570 = vmatmul.mubr.msk.f32.vlgmr.msra.gmra.mrb[6].mxu1 %vm1166_vm2, %v1916_v53 }
0x157c   : > { %v1992_v54 = vpop.f32.mrb[6].mxu1 }
0x157d   : > { %v1993_v55 = vadd.f32 %v4408_v45, %v1992_v54  ;;  %v3571_v56 = vpop.f32.mrb[7].mxu1 }
0x157f   : > { %2004 = vrot.lane.b32.xlu1 %v1993_v55, %s3921_s4  ;;  %v1996_v58 = vadd.f32 %v3029_v57, %v1993_v55 }
0x1581   : > { %v3031_v59 = vmul.f32 -1.442695, %v1996_v58 }
0x1583   : > { %3855 = vpow2.f32 %v3031_v59 }
0x158d   : > { %v3856_v60 = vpop.eup %3855 }
0x158e   : > { %v2000_v61 = vadd.f32 1.0, %v3856_v60 }
0x1590   : > { %3857 = vrcp.f32 %v2000_v61 }
0x159a   : > { %v3858_v62 = vpop.eup %3857 }
0x159b   : > { %v2014_v4 = vsub.f32 1.0, %v3858_v62  ;;  %v2020_v6 = vmul.f32 %v3858_v62, %v1913_v52 }
0x15f1   : > { %v2005_v63 = vpop.permute.xlu1 %2004 }
0x15f2   : > { %v2007_v0 = vmul.f32 %v3858_v62, %v2005_v63 }
0x15f4   : > { %2009 = vrot.lane.b32.xlu0 %v2007_v0, %s3921_s4 }
0x1666   : > { %v2010_v1 = vpop.permute.xlu0 %2009 }
0x1667   : > { %v2012_v2 = vadd.f32 %v3029_v57, %v2010_v1 }
0x1669   : > { %3859 = vtanh.f32 %v2012_v2 }
0x1673   : > { %v3860_v3 = vpop.eup %3859 }
0x1674   : > { %2016 = vrot.lane.b32.xlu1 %v3860_v3, %s3918_s3 }
0x16e6   : > { %v2017_v5 = vpop.permute.xlu1 %2016 }
0x16e7   : > { %v2019_v7 = vmul.f32 %v2017_v5, %v2014_v4 }
0x16e9   : > { %v2021_v17 = vadd.f32 %v2020_v6, %v2019_v7  }
0x16eb   : > { %2023 = vrot.lane.b32.xlu0 %v2021_v17, %s3918_s3 }
0x1758   :  { %1150 = sbr.rel (!%p1148_p0) target bundleno = 321 (0x141), region = 94 }
0x175d   : > { %v2024_v8 = vpop.permute.xlu0 %2023 }
0x175e   : > { %3034 = vst.msk [vmem:[%s4566_s8 + $0x38] sm:$0xff] %vm1166_vm2, %v2024_v8 }
0x175f LB: > { %v3922_v10 = vmov 0.0|0.0   ;;  %s3126_s10 = sshll.u32 %s3915_s9, 8  ;;  %vm3923_vm3 = vmmov 0   ;;  %v3924_v41 = vmov 0.0   ;;  %s3125_s13 = sshll.u32 %s3915_s9, 6  ;;  %s3915_s9 = sphi %s4668_s9, %s2033_s9   ;;  %v3911_v9 = vphi %v4666_v9, %v4794_v9  }
0x1760   : > { %3708 = vmatprep.subr.bf16.mxu1 %v3922_v10  ;;  %3732 = vmatprep.subr.bf16.mxu0 %v3922_v10  ;;  %s4686_s12 = scalar_lea.vmem %s4791_s5, %s3126_s10  ;;  %s4703_s14 = scalar_lea.vmem [#allocation3], %s3125_s13 }
0x1761   : > { %3580 = vmatprep.mubr.msk.f32.mxu1 %vm3923_vm3, %v3924_v41  ;;  %3624 = vmatprep.mubr.msk.f32.mxu0 %vm3923_vm3, %v3924_v41  ;;  %v2041_v42 = vld [vmem:[%s4686_s12] sm:$0xff]  ;;  %v2042_v43 = vld [vmem:[%s4686_s12 + $0x8] sm:$0xff]  ;;  %v2043_v12 = vld [vmem:[%s4686_s12 + $0x10] sm:$0xff]  ;;  %s2033_s9 = sadd.s32 1, %s3915_s9  }
0x1762   : > { %v3074_v44 = vld [vmem:[%s4686_s12 + $0x80] sm:$0xff]  ;;  %v3709_v45 = vpack.c.bf16 %v2042_v43, %v2041_v42  ;;  %v3075_v11 = vld [vmem:[%s4686_s12 + $0x88] sm:$0xff]  ;;  %v2044_v13 = vld [vmem:[%s4686_s12 + $0x18] sm:$0xff]  ;;  %p2030_p1 = scmp.ge.s32.totalorder %s2033_s9, 13  }
0x1763   : > { %v3733_v14 = vpack.c.bf16 %v3075_v11, %v3074_v44  ;;  %v3076_v15 = vld [vmem:[%s4686_s12 + $0x90] sm:$0xff]  ;;  %v3077_v16 = vld [vmem:[%s4686_s12 + $0x98] sm:$0xff]  ;;  %v3712_v18 = vpack.c.bf16 %v2044_v13, %v2043_v12  ;;  %v3044_v17 = vld [vmem:[%s4686_s12 + $0x20] sm:$0xff]  ;;  %vm2716_vm4 = vcmask (%p2030_p1), 25600   ;;  %s3925_s17 = smov (%p2030_p1), [#allocation4]  }
0x1764   : > { %3710 = vmatpush3.bf16.msra.mxu1 %v3709_v45  ;;  %v3736_v20 = vpack.c.bf16 %v3077_v16, %v3076_v15  ;;  %v3045_v46 = vld [vmem:[%s4686_s12 + $0x28] sm:$0xff]  ;;  %v3084_v19 = vld [vmem:[%s4686_s12 + $0xa0] sm:$0xff]  ;;  %v3046_v26 = vld [vmem:[%s4686_s12 + $0x30] sm:$0xff]  ;;  %s2724_s18 = sshll.u32 (%p2030_p1), %s3925_s17, 4  ;;  %s2725_s18 = int_to_ptr.vmem [resolvable:$true] %s2724_s18 }
0x1765   : > { %3734 = vmatpush3.bf16.msra.mxu0 %v3733_v14  ;;  %3711 = vmatprep.subr.bf16.mxu1 %v3922_v10  ;;  %v3085_v21 = vld [vmem:[%s4686_s12 + $0xa8] sm:$0xff]  ;;  %v2038_v22 = vld [vmem:[%s4703_s14] sm:$0xff]  ;;  %v3715_v23 = vpack.c.bf16 %v3045_v46, %v3044_v17  ;;  %v3047_v27 = vld [vmem:[%s4686_s12 + $0x38] sm:$0xff]  ;;  %s3861_s19 = scalar_lea.vmem (%p2030_p1), %s2725_s18, 32  ;;  %p3866_p3 = scmp.lt.s32.totalorder (%p2030_p1), %s2725_s18, %s2725_s18 }
0x1766   : > { %3735 = vmatprep.subr.bf16.mxu0 %v3922_v10  ;;  %v3071_v24 = vld [vmem:[%s4703_s14 + $0x20] sm:$0xff]  ;;  %v3739_v25 = vpack.c.bf16 %v3085_v21, %v3084_v19  ;;  %v3086_v28 = vld [vmem:[%s4686_s12 + $0xb0] sm:$0xff]  ;;  %v3087_v29 = vld [vmem:[%s4686_s12 + $0xb8] sm:$0xff]  ;;  %v3718_v30 = vpack.c.bf16 %v3047_v27, %v3046_v26  ;;  %p3862_p2 = scmp.ne.s32.totalorder (%p2030_p1), %s2725_s18, %s3861_s19  ;;  %p3867_p4 = scmp.lt.s32.totalorder (%p2030_p1), %s3861_s19, %s3861_s19 }
0x1767   : > { %v3742_v31 = vpack.c.bf16 %v3087_v29, %v3086_v28  ;;  %v3054_v32 = vld [vmem:[%s4686_s12 + $0x40] sm:$0xff]  ;;  %v3055_v33 = vld [vmem:[%s4686_s12 + $0x48] sm:$0xff]  ;;  %v3056_v40 = vld [vmem:[%s4686_s12 + $0x50] sm:$0xff] }
0x1768   : > { %3713 = vmatpush3.bf16.msra.mxu1 %v3712_v18  ;;  %v3094_v34 = vld [vmem:[%s4686_s12 + $0xc0] sm:$0xff]  ;;  %v3095_v35 = vld [vmem:[%s4686_s12 + $0xc8] sm:$0xff]  ;;  %v3721_v37 = vpack.c.bf16 %v3055_v33, %v3054_v32  ;;  %v3057_v47 = vld [vmem:[%s4686_s12 + $0x58] sm:$0xff]  ;;  %p3868_p5 = por (%p2030_p1), %p3867_p4, %p3866_p3 }
0x1769   : > { %3737 = vmatpush3.bf16.msra.mxu0 %v3736_v20  ;;  %3714 = vmatprep.subr.bf16.mxu1 %v3922_v10  ;;  %v3041_v36 = vld [vmem:[%s4703_s14 + $0x8] sm:$0xff]  ;;  %v3745_v39 = vpack.c.bf16 %v3095_v35, %v3094_v34  ;;  %v3096_v48 = vld [vmem:[%s4686_s12 + $0xd0] sm:$0xff]  ;;  %v3097_v49 = vld [vmem:[%s4686_s12 + $0xd8] sm:$0xff]  ;;  %v3724_v50 = vpack.c.bf16 %v3057_v47, %v3056_v40 }
0x176a   : > { %3738 = vmatprep.subr.bf16.mxu0 %v3922_v10  ;;  %v3081_v38 = vld [vmem:[%s4703_s14 + $0x28] sm:$0xff]  ;;  %v3748_v51 = vpack.c.bf16 %v3097_v49, %v3096_v48  ;;  %v3064_v52 = vld [vmem:[%s4686_s12 + $0x60] sm:$0xff]  ;;  %v3051_v56 = vld [vmem:[%s4703_s14 + $0x10] sm:$0xff]  ;;  %p3869_p6 = pnand (%p2030_p1), %p3868_p5, %p3862_p2 }
0x176b   : > { %3581 = vmatmul.mubr.msk.f32.vlgmr.msra.gmra.mrb[0].mxu1 %vm1166_vm2, %v2038_v22  ;;  %v3065_v53 = vld [vmem:[%s4686_s12 + $0x68] sm:$0xff]  ;;  %v3104_v54 = vld [vmem:[%s4686_s12 + $0xe0] sm:$0xff]  ;;  %v3091_v58 = vld [vmem:[%s4703_s14 + $0x30] sm:$0xff] }
0x176c   : > { %3625 = vmatmul.mubr.msk.f32.vlgmr.msra.gmra.mrb[0].mxu0 %vm1166_vm2, %v3071_v24  ;;  %3716 = vmatpush3.bf16.msra.mxu1 %v3715_v23  ;;  %v3105_v55 = vld [vmem:[%s4686_s12 + $0xe8] sm:$0xff]  ;;  %v3727_v57 = vpack.c.bf16 %v3065_v53, %v3064_v52  ;;  %v3066_v60 = vld [vmem:[%s4686_s12 + $0x70] sm:$0xff]  ;;  %v3067_v61 = vld [vmem:[%s4686_s12 + $0x78] sm:$0xff] }
0x176d   : > { %3740 = vmatpush3.bf16.msra.mxu0 %v3739_v25  ;;  %3717 = vmatprep.subr.bf16.mxu1 %v3922_v10  ;;  %v3751_v59 = vpack.c.bf16 %v3105_v55, %v3104_v54  ;;  %v3106_v62 = vld [vmem:[%s4686_s12 + $0xf0] sm:$0xff]  ;;  %v3107_v63 = vld [vmem:[%s4686_s12 + $0xf8] sm:$0xff]  ;;  %v3730_v0 = vpack.c.bf16 %v3067_v61, %v3066_v60 }
0x176e   : > { %3741 = vmatprep.subr.bf16.mxu0 %v3922_v10  ;;  %3591 = vmatprep.mubr.msk.f32.mxu1 %vm3923_vm3, %v3924_v41  ;;  %v3754_v1 = vpack.c.bf16 %v3107_v63, %v3106_v62  ;;  %v3061_v2 = vld [vmem:[%s4703_s14 + $0x18] sm:$0xff] }
0x176f   : > { %3635 = vmatprep.mubr.msk.f32.mxu0 %vm3923_vm3, %v3924_v41  ;;  %v3101_v3 = vld [vmem:[%s4703_s14 + $0x38] sm:$0xff] }
0x1770   : > { %3719 = vmatpush3.bf16.msra.mxu1 %v3718_v30 }
0x1771   : > { %3743 = vmatpush3.bf16.msra.mxu0 %v3742_v31  ;;  %3720 = vmatprep.subr.bf16.mxu1 %v3922_v10 }
0x1772   : > { %3744 = vmatprep.subr.bf16.mxu0 %v3922_v10 }
0x1773   : > { %3592 = vmatmul.mubr.msk.f32.vlgmr.msra.gmra.mrb[0].mxu1 %vm1166_vm2, %v3041_v36 }
0x1774   : > { %3636 = vmatmul.mubr.msk.f32.vlgmr.msra.gmra.mrb[0].mxu0 %vm1166_vm2, %v3081_v38  ;;  %3722 = vmatpush3.bf16.msra.mxu1 %v3721_v37 }
0x1775   : > { %3746 = vmatpush3.bf16.msra.mxu0 %v3745_v39  ;;  %3723 = vmatprep.subr.bf16.mxu1 %v3922_v10 }
0x1776   : > { %3747 = vmatprep.subr.bf16.mxu0 %v3922_v10  ;;  %3602 = vmatprep.mubr.msk.f32.mxu1 %vm3923_vm3, %v3924_v41 }
0x1777   : > { %3646 = vmatprep.mubr.msk.f32.mxu0 %vm3923_vm3, %v3924_v41 }
0x1778   : > { %3725 = vmatpush3.bf16.msra.mxu1 %v3724_v50 }
0x1779   : > { %3749 = vmatpush3.bf16.msra.mxu0 %v3748_v51  ;;  %3726 = vmatprep.subr.bf16.mxu1 %v3922_v10 }
0x177a   : > { %3750 = vmatprep.subr.bf16.mxu0 %v3922_v10 }
0x177b   : > { %3603 = vmatmul.mubr.msk.f32.vlgmr.msra.gmra.mrb[0].mxu1 %vm1166_vm2, %v3051_v56 }
0x177c   : > { %3647 = vmatmul.mubr.msk.f32.vlgmr.msra.gmra.mrb[0].mxu0 %vm1166_vm2, %v3091_v58  ;;  %3728 = vmatpush3.bf16.msra.mxu1 %v3727_v57 }
0x177d   : > { %3752 = vmatpush3.bf16.msra.mxu0 %v3751_v59  ;;  %3729 = vmatprep.subr.bf16.mxu1 %v3922_v10 }
0x177e   : > { %3753 = vmatprep.subr.bf16.mxu0 %v3922_v10  ;;  %3613 = vmatprep.mubr.msk.f32.mxu1 %vm3923_vm3, %v3924_v41 }
0x177f   : > { %3657 = vmatprep.mubr.msk.f32.mxu0 %vm3923_vm3, %v3924_v41  ;;  %v3109_v41 = vld [vmem:[%s4792_s6] ss:$0 sm:$0xff] (%p2030_p1) }
0x1780   : > { %3731 = vmatpush3.bf16.msra.mxu1 %v3730_v0 }
0x1781   : > { %3755 = vmatpush3.bf16.msra.mxu0 %v3754_v1 }
0x1783   : > { %3614 = vmatmul.mubr.msk.f32.vlgmr.msra.gmra.mrb[0].mxu1 %vm1166_vm2, %v3061_v2 }
0x1784   : > { %3658 = vmatmul.mubr.msk.f32.vlgmr.msra.gmra.mrb[0].mxu0 %vm1166_vm2, %v3101_v3 }
0x1855   :  { %2032 = sbr.rel (!%p2030_p1) target bundleno = 5983 (0x175f), region = 105 }
0x1856   : > { %v2367_v4 = vpop.f32.mrb[0].mxu1 }
0x1857   : > { %v3758_v5 = vadd.f32 %v3911_v9, %v2367_v4  ;;  %v2703_v6 = vpop.f32.mrb[0].mxu0  ;;  %v3615_v7 = vpop.f32.mrb[1].mxu1 }
0x1858   : > { %v3659_v8 = vpop.f32.mrb[1].mxu0 }
0x1859   : > { %v3759_v10 = vadd.f32 %v3758_v5, %v2703_v6  }
0x185b   : > { %v4794_v9 = vmov %v3759_v10  ;;  %v2715_v42 = vadd.f32 (%p2030_p1), %v3759_v10, %v3109_v41 }
0x185d   :  { %2717 = vst.msk [vmem:[#allocation4] sm:$0x3] %vm2716_vm4, %v2715_v42 }
0x185e   :  { %3872 = shalt.err (!%p3869_p6)
}
0x185f   :  { %s3873_s5 = scalar_lea.hbm %s4793_s7, 32 }
0x1860   :  { %p3874_p7 = scmp.ne.s32.totalorder %s4793_s7, %s3873_s5  ;;  %p3877_p8 = scmp.lt.u32.totalorder %s3873_s5, %s4793_s7 }
0x1862   :  { %p3879_p9 = pnand %p3877_p8, %p3874_p7 }
0x1864   :  { %3882 = shalt.err (!%p3879_p9)
}
0x1865   :  { %2727 = dma.vmem_to_hbm [thread:$0]  %s2725_s18, 32, %s4793_s7, [#allocation5]  }
0x1866   :  { %3899 = dma.done.wait [#allocation5], 32  }
0x1867   :  { %3900 = vsyncadd [#allocation5], 4294967264 }
0x1868   :  { %2731 = vsyncpa [#allocation5], 1 }

</bundles_post_ra>
